<compile_context>
chip_gen: v6e
topology: v6e:2x2x1
jax: 0.10.0
libtpu: 0.0.40
codegen_flags: <defaults>
</compile_context>

<pallas_src>
import jax
import jax.numpy as jnp
from jax import lax
from jax.experimental import pallas as pl
from jax.experimental.pallas import tpu as pltpu


LANES = 128


def _round_up(n, m):
    return ((n + m - 1) // m) * m


def pos_lstm_kernel(x_ref, wih_ref, whh_ref, b_ref, wlin_ref, blin_ref,
                    out_ref, h_ref, c_ref, xproj_ref, hall_ref):
    seq, Hp = hall_ref.shape

    # -- hoisted, batched input projection: (seq, E) @ (E, 4*Hp) + bias -------
    xproj_ref[...] = (jnp.dot(x_ref[...], wih_ref[...],
                              preferred_element_type=jnp.float32)
                      + b_ref[...])

    # initial hidden / cell state = 0 (PyTorch default when h0/c0 not given)
    h_ref[...] = jnp.zeros_like(h_ref)
    c_ref[...] = jnp.zeros_like(c_ref)

    def step(t, carry):
        # single recurrent matmul per step: (1, Hp) @ (Hp, 4*Hp)
        gates = (xproj_ref[pl.ds(t, 1), :]
                 + jnp.dot(h_ref[...], whh_ref[...],
                           preferred_element_type=jnp.float32))   # (1, 4*Hp)

        # packed gate layout: [ i | f | o | g ], each Hp lanes wide
        sig = jax.nn.sigmoid(gates[:, :3 * Hp])   # one EUP slab for i, f, o
        i_g = sig[:, 0 * Hp:1 * Hp]
        f_g = sig[:, 1 * Hp:2 * Hp]
        o_g = sig[:, 2 * Hp:3 * Hp]
        g_g = jnp.tanh(gates[:, 3 * Hp:4 * Hp])

        c_new = f_g * c_ref[...] + i_g * g_g
        h_new = o_g * jnp.tanh(c_new)

        c_ref[...] = c_new
        h_ref[...] = h_new
        hall_ref[pl.ds(t, 1), :] = h_new          # lane-dense (1, Hp) store
        return carry

    # short fixed trip-count -> fully unroll so the scheduler sees the body
    lax.fori_loop(0, seq, step, 0, unroll=True)

    # final Linear over all timesteps: (seq, Hp) @ (Hp, Pp) + (1, Pp)
    out_ref[...] = (jnp.dot(hall_ref[...], wlin_ref[...],
                            preferred_element_type=jnp.float32)
                    + blin_ref[...])


def _pack_gate_weight(w, H, Hp):
    """PyTorch LSTM weight (4H, in_dim), gate order [i,f,g,o] ->
    packed (in_dim, 4*Hp), gate order [i,f,o,g], each gate zero-padded to Hp."""
    in_dim = w.shape[1]
    w4 = w.reshape(4, H, in_dim).astype(jnp.float32)      # (4, H, in)
    w4 = w4[jnp.array([0, 1, 3, 2])]                      # reorder -> [i,f,o,g]
    w4 = jnp.transpose(w4, (0, 2, 1))                     # (4, in, H)
    w4 = jnp.pad(w4, ((0, 0), (0, 0), (0, Hp - H)))       # (4, in, Hp)
    return jnp.concatenate(list(w4), axis=-1)             # (in, 4*Hp)


def _pack_gate_bias(b_ih, b_hh, H, Hp):
    b = (b_ih + b_hh).reshape(4, H).astype(jnp.float32)
    b = b[jnp.array([0, 1, 3, 2])]                        # reorder -> [i,f,o,g]
    b = jnp.pad(b, ((0, 0), (0, Hp - H)))                 # (4, Hp)
    return b.reshape(1, 4 * Hp)


def pos_lstm_forward(idx, embed_tbl, w_ih, w_hh, b_ih, b_hh, w_lin, b_lin):
    """Wrapper: packs PyTorch-layout parameters and calls the Pallas kernel."""
    seq = idx.shape[0]
    vocab, E = embed_tbl.shape
    H = w_hh.shape[1]
    P = w_lin.shape[0]
    Hp = _round_up(H, LANES)
    Pp = _round_up(P, LANES)

    # Embedding gather in the wrapper: no table in VMEM, no per-step gather,
    # and out-of-range indices are clamped (Pallas VMEM refs are unchecked).
    x = jnp.take(embed_tbl.astype(jnp.float32),
                 jnp.clip(idx.astype(jnp.int32), 0, vocab - 1), axis=0)  # (seq, E)

    # Packed, lane-padded weights.  Zero padding is exact: padded lanes of the
    # gates stay at sigmoid(0)/tanh(0), which keeps padded h/c lanes at 0.
    wih_p = _pack_gate_weight(w_ih, H, Hp)                        # (E, 4*Hp)
    whh_p = _pack_gate_weight(w_hh, H, Hp)                        # (H, 4*Hp)
    whh_p = jnp.pad(whh_p, ((0, Hp - H), (0, 0)))                 # (Hp, 4*Hp)
    b_p = _pack_gate_bias(b_ih, b_hh, H, Hp)                      # (1, 4*Hp)
    wlin_p = jnp.pad(w_lin.T.astype(jnp.float32),
                     ((0, Hp - H), (0, Pp - P)))                  # (Hp, Pp)
    blin_p = jnp.pad(b_lin.reshape(1, P).astype(jnp.float32),
                     ((0, 0), (0, Pp - P)))                       # (1, Pp)

    # TODO(synk): for large seq/E on v6e/v7x the two batched matmuls could run
    # with bf16 inputs (f32 accumulation); kept f32 here for exact parity.

    # Explicit VMEM budget (inputs + output + scratch), with headroom.
    vmem_bytes = 4 * (seq * E + E * 4 * Hp + Hp * 4 * Hp + 4 * Hp
                      + Hp * Pp + Pp + seq * Pp
                      + 2 * Hp + seq * 4 * Hp + seq * Hp)
    vmem_limit = int(min(max(4 * vmem_bytes, 4 * 1024 * 1024), 100 * 1024 * 1024))

    out = pl.pallas_call(
        pos_lstm_kernel,
        out_shape=jax.ShapeDtypeStruct((seq, Pp), jnp.float32),
        in_specs=[
            pl.BlockSpec(memory_space=pltpu.MemorySpace.VMEM),   # x  (seq, E)
            pl.BlockSpec(memory_space=pltpu.MemorySpace.VMEM),   # W_ih packed
            pl.BlockSpec(memory_space=pltpu.MemorySpace.VMEM),   # W_hh packed
            pl.BlockSpec(memory_space=pltpu.MemorySpace.VMEM),   # bias packed
            pl.BlockSpec(memory_space=pltpu.MemorySpace.VMEM),   # W_lin padded
            pl.BlockSpec(memory_space=pltpu.MemorySpace.VMEM),   # b_lin padded
        ],
        out_specs=pl.BlockSpec(memory_space=pltpu.MemorySpace.VMEM),
        scratch_shapes=[
            pltpu.VMEM((1, Hp), jnp.float32),        # h state
            pltpu.VMEM((1, Hp), jnp.float32),        # c state
            pltpu.VMEM((seq, 4 * Hp), jnp.float32),  # hoisted input projection
            pltpu.VMEM((seq, Hp), jnp.float32),      # all hidden states
        ],
        compiler_params=pltpu.CompilerParams(vmem_limit_bytes=vmem_limit),
    )(x, wih_p, whh_p, b_p, wlin_p, blin_p)

    # drop lane padding; match PyTorch output shape (seq, 1, parts)
    return out[:, :P].reshape(seq, 1, P)


def pos_lstm_reference(idx, embed_tbl, w_ih, w_hh, b_ih, b_hh, w_lin, b_lin):
    """Pure-JAX reference mirroring torch.nn.LSTM semantics (gate order i,f,g,o)."""
    H = w_hh.shape[1]
    x = embed_tbl[idx]                                # (seq, E)
    h = jnp.zeros((H,), jnp.float32)
    c = jnp.zeros((H,), jnp.float32)
    outs = []
    for t in range(idx.shape[0]):
        gates = w_ih @ x[t] + b_ih + w_hh @ h + b_hh
        i = jax.nn.sigmoid(gates[0 * H:1 * H])
        f = jax.nn.sigmoid(gates[1 * H:2 * H])
        g = jnp.tanh(gates[2 * H:3 * H])
        o = jax.nn.sigmoid(gates[3 * H:4 * H])
        c = f * c + i * g
        h = o * jnp.tanh(c)
        outs.append(h)
    hs = jnp.stack(outs)                              # (seq, H)
    return (hs @ w_lin.T + b_lin).reshape(idx.shape[0], 1, -1)


if __name__ == "__main__":
    # small, deterministic synthetic sizes consistent with the module
    vocab_size, embed_dim, hidden_dim, parts_size = 16, 8, 8, 4
    seq_len = 8

    key = jax.random.PRNGKey(0)
    ks = jax.random.split(key, 8)

    idx = jax.random.randint(ks[0], (seq_len,), 0, vocab_size, dtype=jnp.int32)
    embed_tbl = jax.random.normal(ks[1], (vocab_size, embed_dim), jnp.float32)
    w_ih = 0.3 * jax.random.normal(ks[2], (4 * hidden_dim, embed_dim), jnp.float32)
    w_hh = 0.3 * jax.random.normal(ks[3], (4 * hidden_dim, hidden_dim), jnp.float32)
    b_ih = 0.1 * jax.random.normal(ks[4], (4 * hidden_dim,), jnp.float32)
    b_hh = 0.1 * jax.random.normal(ks[5], (4 * hidden_dim,), jnp.float32)
    w_lin = 0.3 * jax.random.normal(ks[6], (parts_size, hidden_dim), jnp.float32)
    b_lin = 0.1 * jax.random.normal(ks[7], (parts_size,), jnp.float32)

    out = pos_lstm_forward(idx, embed_tbl, w_ih, w_hh, b_ih, b_hh, w_lin, b_lin)
    out = jax.block_until_ready(out)

    ref = pos_lstm_reference(idx, embed_tbl, w_ih, w_hh, b_ih, b_hh, w_lin, b_lin)
    assert out.shape == (seq_len, 1, parts_size)
    assert jnp.allclose(out, ref, atol=1e-5, rtol=1e-5)

    print("KERNEL_OK")
</pallas_src>

<mosaic_0001>
module attributes {stable_mosaic.version = 11 : i64} {
  func.func @pos_lstm_kernel(%arg0: memref<8x8xf32, #tpu.memory_space<vmem>>, %arg1: memref<8x512xf32, #tpu.memory_space<vmem>>, %arg2: memref<128x512xf32, #tpu.memory_space<vmem>>, %arg3: memref<1x512xf32, #tpu.memory_space<vmem>>, %arg4: memref<128x128xf32, #tpu.memory_space<vmem>>, %arg5: memref<1x128xf32, #tpu.memory_space<vmem>>, %arg6: memref<8x128xf32, #tpu.memory_space<vmem>>, %arg7: memref<1x128xf32, #tpu.memory_space<vmem>>, %arg8: memref<1x128xf32, #tpu.memory_space<vmem>>, %arg9: memref<8x512xf32, #tpu.memory_space<vmem>>, %arg10: memref<8x128xf32, #tpu.memory_space<vmem>>) attributes {dimension_semantics = [], scalar_prefetch = 0 : i64, scratch_operands = 4 : i64, tpu.core_type = #tpu.core_type<tc>} {
    %c0 = arith.constant 0 : index
    %c0_0 = arith.constant 0 : index
    %0 = vector.load %arg0[%c0, %c0_0] : memref<8x8xf32, #tpu.memory_space<vmem>>, vector<8x8xf32>
    %c0_1 = arith.constant 0 : index
    %c0_2 = arith.constant 0 : index
    %1 = vector.load %arg1[%c0_1, %c0_2] : memref<8x512xf32, #tpu.memory_space<vmem>>, vector<8x512xf32>
    %cst = arith.constant dense<0.000000e+00> : vector<8x512xf32>
    %2 = tpu.matmul %0, %1, %cst {dimension_numbers = #tpu.dot_dimension_numbers<[1], [0], [0], [1], [0, 0, 1, 1], [], []>} : vector<8x8xf32>, vector<8x512xf32>, vector<8x512xf32> -> vector<8x512xf32>
    %c0_3 = arith.constant 0 : index
    %c0_4 = arith.constant 0 : index
    %3 = vector.load %arg3[%c0_3, %c0_4] : memref<1x512xf32, #tpu.memory_space<vmem>>, vector<1x512xf32>
    %4 = vector.broadcast %3 : vector<1x512xf32> to vector<8x512xf32>
    %5 = arith.addf %2, %4 : vector<8x512xf32>
    %c0_5 = arith.constant 0 : index
    %c0_6 = arith.constant 0 : index
    %6 = vector.load %arg9[%c0_5, %c0_6] : memref<8x512xf32, #tpu.memory_space<vmem>>, vector<8x512xf32>
    tpu.vector_store %arg9[%c0_5, %c0_6], %5 {strides = array<i32>} : memref<8x512xf32, #tpu.memory_space<vmem>>, vector<8x512xf32>,
    %cst_7 = arith.constant 0.000000e+00 : f32
    %7 = vector.broadcast %cst_7 : f32 to vector<1x128xf32>
    %c0_8 = arith.constant 0 : index
    %c0_9 = arith.constant 0 : index
    %8 = vector.load %arg7[%c0_8, %c0_9] : memref<1x128xf32, #tpu.memory_space<vmem>>, vector<1x128xf32>
    tpu.vector_store %arg7[%c0_8, %c0_9], %7 {strides = array<i32>} : memref<1x128xf32, #tpu.memory_space<vmem>>, vector<1x128xf32>,
    %cst_10 = arith.constant 0.000000e+00 : f32
    %9 = vector.broadcast %cst_10 : f32 to vector<1x128xf32>
    %c0_11 = arith.constant 0 : index
    %c0_12 = arith.constant 0 : index
    %10 = vector.load %arg8[%c0_11, %c0_12] : memref<1x128xf32, #tpu.memory_space<vmem>>, vector<1x128xf32>
    tpu.vector_store %arg8[%c0_11, %c0_12], %9 {strides = array<i32>} : memref<1x128xf32, #tpu.memory_space<vmem>>, vector<1x128xf32>,
    %c0_i32 = arith.constant 0 : i32
    %11 = arith.index_cast %c0_i32 : i32 to index
    %c0_13 = arith.constant 0 : index
    %12 = vector.load %arg9[%11, %c0_13] : memref<8x512xf32, #tpu.memory_space<vmem>>, vector<1x512xf32>
    %c0_14 = arith.constant 0 : index
    %c0_15 = arith.constant 0 : index
    %13 = vector.load %arg7[%c0_14, %c0_15] : memref<1x128xf32, #tpu.memory_space<vmem>>, vector<1x128xf32>
    %c0_16 = arith.constant 0 : index
    %c0_17 = arith.constant 0 : index
    %14 = vector.load %arg2[%c0_16, %c0_17] : memref<128x512xf32, #tpu.memory_space<vmem>>, vector<128x512xf32>
    %cst_18 = arith.constant dense<0.000000e+00> : vector<1x512xf32>
    %15 = tpu.matmul %13, %14, %cst_18 {dimension_numbers = #tpu.dot_dimension_numbers<[1], [0], [0], [1], [0, 0, 1, 1], [], []>} : vector<1x128xf32>, vector<128x512xf32>, vector<1x512xf32> -> vector<1x512xf32>
    %16 = arith.addf %12, %15 : vector<1x512xf32>
    %17 = vector.extract_strided_slice %16 {offsets = [0, 0], sizes = [1, 384], strides = [1, 1]} : vector<1x512xf32> to vector<1x384xf32>
    %18 = arith.negf %17 : vector<1x384xf32>
    %19 = math.exp %18 : vector<1x384xf32>
    %cst_19 = arith.constant 1.000000e+00 : f32
    %20 = vector.broadcast %cst_19 : f32 to vector<1x384xf32>
    %21 = arith.addf %20, %19 : vector<1x384xf32>
    %22 = arith.divf %20, %21 : vector<1x384xf32>
    %23 = vector.extract_strided_slice %22 {offsets = [0, 0], sizes = [1, 128], strides = [1, 1]} : vector<1x384xf32> to vector<1x128xf32>
    %24 = vector.extract_strided_slice %22 {offsets = [0, 128], sizes = [1, 128], strides = [1, 1]} : vector<1x384xf32> to vector<1x128xf32>
    %25 = vector.extract_strided_slice %22 {offsets = [0, 256], sizes = [1, 128], strides = [1, 1]} : vector<1x384xf32> to vector<1x128xf32>
    %26 = vector.extract_strided_slice %16 {offsets = [0, 384], sizes = [1, 128], strides = [1, 1]} : vector<1x512xf32> to vector<1x128xf32>
    %27 = math.tanh %26 : vector<1x128xf32>
    %c0_20 = arith.constant 0 : index
    %c0_21 = arith.constant 0 : index
    %28 = vector.load %arg8[%c0_20, %c0_21] : memref<1x128xf32, #tpu.memory_space<vmem>>, vector<1x128xf32>
    %29 = arith.mulf %24, %28 : vector<1x128xf32>
    %30 = arith.mulf %23, %27 : vector<1x128xf32>
    %31 = arith.addf %29, %30 : vector<1x128xf32>
    %32 = math.tanh %31 : vector<1x128xf32>
    %33 = arith.mulf %25, %32 : vector<1x128xf32>
    %c0_22 = arith.constant 0 : index
    %c0_23 = arith.constant 0 : index
    %34 = vector.load %arg8[%c0_22, %c0_23] : memref<1x128xf32, #tpu.memory_space<vmem>>, vector<1x128xf32>
    tpu.vector_store %arg8[%c0_22, %c0_23], %31 {strides = array<i32>} : memref<1x128xf32, #tpu.memory_space<vmem>>, vector<1x128xf32>,
    %c0_24 = arith.constant 0 : index
    %c0_25 = arith.constant 0 : index
    %35 = vector.load %arg7[%c0_24, %c0_25] : memref<1x128xf32, #tpu.memory_space<vmem>>, vector<1x128xf32>
    tpu.vector_store %arg7[%c0_24, %c0_25], %33 {strides = array<i32>} : memref<1x128xf32, #tpu.memory_space<vmem>>, vector<1x128xf32>,
    %36 = arith.index_cast %c0_i32 : i32 to index
    %c0_26 = arith.constant 0 : index
    %37 = vector.load %arg10[%36, %c0_26] : memref<8x128xf32, #tpu.memory_space<vmem>>, vector<1x128xf32>
    tpu.vector_store %arg10[%36, %c0_26], %33 {strides = array<i32>} : memref<8x128xf32, #tpu.memory_space<vmem>>, vector<1x128xf32>,
    %c1_i32 = arith.constant 1 : i32
    %38 = arith.index_cast %c1_i32 : i32 to index
    %c0_27 = arith.constant 0 : index
    %39 = vector.load %arg9[%38, %c0_27] : memref<8x512xf32, #tpu.memory_space<vmem>>, vector<1x512xf32>
    %c0_28 = arith.constant 0 : index
    %c0_29 = arith.constant 0 : index
    %40 = vector.load %arg7[%c0_28, %c0_29] : memref<1x128xf32, #tpu.memory_space<vmem>>, vector<1x128xf32>
    %c0_30 = arith.constant 0 : index
    %c0_31 = arith.constant 0 : index
    %41 = vector.load %arg2[%c0_30, %c0_31] : memref<128x512xf32, #tpu.memory_space<vmem>>, vector<128x512xf32>
    %cst_32 = arith.constant dense<0.000000e+00> : vector<1x512xf32>
    %42 = tpu.matmul %40, %41, %cst_32 {dimension_numbers = #tpu.dot_dimension_numbers<[1], [0], [0], [1], [0, 0, 1, 1], [], []>} : vector<1x128xf32>, vector<128x512xf32>, vector<1x512xf32> -> vector<1x512xf32>
    %43 = arith.addf %39, %42 : vector<1x512xf32>
    %44 = vector.extract_strided_slice %43 {offsets = [0, 0], sizes = [1, 384], strides = [1, 1]} : vector<1x512xf32> to vector<1x384xf32>
    %45 = arith.negf %44 : vector<1x384xf32>
    %46 = math.exp %45 : vector<1x384xf32>
    %cst_33 = arith.constant 1.000000e+00 : f32
    %47 = vector.broadcast %cst_33 : f32 to vector<1x384xf32>
    %48 = arith.addf %47, %46 : vector<1x384xf32>
    %49 = arith.divf %47, %48 : vector<1x384xf32>
    %50 = vector.extract_strided_slice %49 {offsets = [0, 0], sizes = [1, 128], strides = [1, 1]} : vector<1x384xf32> to vector<1x128xf32>
    %51 = vector.extract_strided_slice %49 {offsets = [0, 128], sizes = [1, 128], strides = [1, 1]} : vector<1x384xf32> to vector<1x128xf32>
    %52 = vector.extract_strided_slice %49 {offsets = [0, 256], sizes = [1, 128], strides = [1, 1]} : vector<1x384xf32> to vector<1x128xf32>
    %53 = vector.extract_strided_slice %43 {offsets = [0, 384], sizes = [1, 128], strides = [1, 1]} : vector<1x512xf32> to vector<1x128xf32>
    %54 = math.tanh %53 : vector<1x128xf32>
    %c0_34 = arith.constant 0 : index
    %c0_35 = arith.constant 0 : index
    %55 = vector.load %arg8[%c0_34, %c0_35] : memref<1x128xf32, #tpu.memory_space<vmem>>, vector<1x128xf32>
    %56 = arith.mulf %51, %55 : vector<1x128xf32>
    %57 = arith.mulf %50, %54 : vector<1x128xf32>
    %58 = arith.addf %56, %57 : vector<1x128xf32>
    %59 = math.tanh %58 : vector<1x128xf32>
    %60 = arith.mulf %52, %59 : vector<1x128xf32>
    %c0_36 = arith.constant 0 : index
    %c0_37 = arith.constant 0 : index
    %61 = vector.load %arg8[%c0_36, %c0_37] : memref<1x128xf32, #tpu.memory_space<vmem>>, vector<1x128xf32>
    tpu.vector_store %arg8[%c0_36, %c0_37], %58 {strides = array<i32>} : memref<1x128xf32, #tpu.memory_space<vmem>>, vector<1x128xf32>,
    %c0_38 = arith.constant 0 : index
    %c0_39 = arith.constant 0 : index
    %62 = vector.load %arg7[%c0_38, %c0_39] : memref<1x128xf32, #tpu.memory_space<vmem>>, vector<1x128xf32>
    tpu.vector_store %arg7[%c0_38, %c0_39], %60 {strides = array<i32>} : memref<1x128xf32, #tpu.memory_space<vmem>>, vector<1x128xf32>,
    %63 = arith.index_cast %c1_i32 : i32 to index
    %c0_40 = arith.constant 0 : index
    %64 = vector.load %arg10[%63, %c0_40] : memref<8x128xf32, #tpu.memory_space<vmem>>, vector<1x128xf32>
    tpu.vector_store %arg10[%63, %c0_40], %60 {strides = array<i32>} : memref<8x128xf32, #tpu.memory_space<vmem>>, vector<1x128xf32>,
    %c2_i32 = arith.constant 2 : i32
    %65 = arith.index_cast %c2_i32 : i32 to index
    %c0_41 = arith.constant 0 : index
    %66 = vector.load %arg9[%65, %c0_41] : memref<8x512xf32, #tpu.memory_space<vmem>>, vector<1x512xf32>
    %c0_42 = arith.constant 0 : index
    %c0_43 = arith.constant 0 : index
    %67 = vector.load %arg7[%c0_42, %c0_43] : memref<1x128xf32, #tpu.memory_space<vmem>>, vector<1x128xf32>
    %c0_44 = arith.constant 0 : index
    %c0_45 = arith.constant 0 : index
    %68 = vector.load %arg2[%c0_44, %c0_45] : memref<128x512xf32, #tpu.memory_space<vmem>>, vector<128x512xf32>
    %cst_46 = arith.constant dense<0.000000e+00> : vector<1x512xf32>
    %69 = tpu.matmul %67, %68, %cst_46 {dimension_numbers = #tpu.dot_dimension_numbers<[1], [0], [0], [1], [0, 0, 1, 1], [], []>} : vector<1x128xf32>, vector<128x512xf32>, vector<1x512xf32> -> vector<1x512xf32>
    %70 = arith.addf %66, %69 : vector<1x512xf32>
    %71 = vector.extract_strided_slice %70 {offsets = [0, 0], sizes = [1, 384], strides = [1, 1]} : vector<1x512xf32> to vector<1x384xf32>
    %72 = arith.negf %71 : vector<1x384xf32>
    %73 = math.exp %72 : vector<1x384xf32>
    %cst_47 = arith.constant 1.000000e+00 : f32
    %74 = vector.broadcast %cst_47 : f32 to vector<1x384xf32>
    %75 = arith.addf %74, %73 : vector<1x384xf32>
    %76 = arith.divf %74, %75 : vector<1x384xf32>
    %77 = vector.extract_strided_slice %76 {offsets = [0, 0], sizes = [1, 128], strides = [1, 1]} : vector<1x384xf32> to vector<1x128xf32>
    %78 = vector.extract_strided_slice %76 {offsets = [0, 128], sizes = [1, 128], strides = [1, 1]} : vector<1x384xf32> to vector<1x128xf32>
    %79 = vector.extract_strided_slice %76 {offsets = [0, 256], sizes = [1, 128], strides = [1, 1]} : vector<1x384xf32> to vector<1x128xf32>
    %80 = vector.extract_strided_slice %70 {offsets = [0, 384], sizes = [1, 128], strides = [1, 1]} : vector<1x512xf32> to vector<1x128xf32>
    %81 = math.tanh %80 : vector<1x128xf32>
    %c0_48 = arith.constant 0 : index
    %c0_49 = arith.constant 0 : index
    %82 = vector.load %arg8[%c0_48, %c0_49] : memref<1x128xf32, #tpu.memory_space<vmem>>, vector<1x128xf32>
    %83 = arith.mulf %78, %82 : vector<1x128xf32>
    %84 = arith.mulf %77, %81 : vector<1x128xf32>
    %85 = arith.addf %83, %84 : vector<1x128xf32>
    %86 = math.tanh %85 : vector<1x128xf32>
    %87 = arith.mulf %79, %86 : vector<1x128xf32>
    %c0_50 = arith.constant 0 : index
    %c0_51 = arith.constant 0 : index
    %88 = vector.load %arg8[%c0_50, %c0_51] : memref<1x128xf32, #tpu.memory_space<vmem>>, vector<1x128xf32>
    tpu.vector_store %arg8[%c0_50, %c0_51], %85 {strides = array<i32>} : memref<1x128xf32, #tpu.memory_space<vmem>>, vector<1x128xf32>,
    %c0_52 = arith.constant 0 : index
    %c0_53 = arith.constant 0 : index
    %89 = vector.load %arg7[%c0_52, %c0_53] : memref<1x128xf32, #tpu.memory_space<vmem>>, vector<1x128xf32>
    tpu.vector_store %arg7[%c0_52, %c0_53], %87 {strides = array<i32>} : memref<1x128xf32, #tpu.memory_space<vmem>>, vector<1x128xf32>,
    %90 = arith.index_cast %c2_i32 : i32 to index
    %c0_54 = arith.constant 0 : index
    %91 = vector.load %arg10[%90, %c0_54] : memref<8x128xf32, #tpu.memory_space<vmem>>, vector<1x128xf32>
    tpu.vector_store %arg10[%90, %c0_54], %87 {strides = array<i32>} : memref<8x128xf32, #tpu.memory_space<vmem>>, vector<1x128xf32>,
    %c3_i32 = arith.constant 3 : i32
    %92 = arith.index_cast %c3_i32 : i32 to index
    %c0_55 = arith.constant 0 : index
    %93 = vector.load %arg9[%92, %c0_55] : memref<8x512xf32, #tpu.memory_space<vmem>>, vector<1x512xf32>
    %c0_56 = arith.constant 0 : index
    %c0_57 = arith.constant 0 : index
    %94 = vector.load %arg7[%c0_56, %c0_57] : memref<1x128xf32, #tpu.memory_space<vmem>>, vector<1x128xf32>
    %c0_58 = arith.constant 0 : index
    %c0_59 = arith.constant 0 : index
    %95 = vector.load %arg2[%c0_58, %c0_59] : memref<128x512xf32, #tpu.memory_space<vmem>>, vector<128x512xf32>
    %cst_60 = arith.constant dense<0.000000e+00> : vector<1x512xf32>
    %96 = tpu.matmul %94, %95, %cst_60 {dimension_numbers = #tpu.dot_dimension_numbers<[1], [0], [0], [1], [0, 0, 1, 1], [], []>} : vector<1x128xf32>, vector<128x512xf32>, vector<1x512xf32> -> vector<1x512xf32>
    %97 = arith.addf %93, %96 : vector<1x512xf32>
    %98 = vector.extract_strided_slice %97 {offsets = [0, 0], sizes = [1, 384], strides = [1, 1]} : vector<1x512xf32> to vector<1x384xf32>
    %99 = arith.negf %98 : vector<1x384xf32>
    %100 = math.exp %99 : vector<1x384xf32>
    %cst_61 = arith.constant 1.000000e+00 : f32
    %101 = vector.broadcast %cst_61 : f32 to vector<1x384xf32>
    %102 = arith.addf %101, %100 : vector<1x384xf32>
    %103 = arith.divf %101, %102 : vector<1x384xf32>
    %104 = vector.extract_strided_slice %103 {offsets = [0, 0], sizes = [1, 128], strides = [1, 1]} : vector<1x384xf32> to vector<1x128xf32>
    %105 = vector.extract_strided_slice %103 {offsets = [0, 128], sizes = [1, 128], strides = [1, 1]} : vector<1x384xf32> to vector<1x128xf32>
    %106 = vector.extract_strided_slice %103 {offsets = [0, 256], sizes = [1, 128], strides = [1, 1]} : vector<1x384xf32> to vector<1x128xf32>
    %107 = vector.extract_strided_slice %97 {offsets = [0, 384], sizes = [1, 128], strides = [1, 1]} : vector<1x512xf32> to vector<1x128xf32>
    %108 = math.tanh %107 : vector<1x128xf32>
    %c0_62 = arith.constant 0 : index
    %c0_63 = arith.constant 0 : index
    %109 = vector.load %arg8[%c0_62, %c0_63] : memref<1x128xf32, #tpu.memory_space<vmem>>, vector<1x128xf32>
    %110 = arith.mulf %105, %109 : vector<1x128xf32>
    %111 = arith.mulf %104, %108 : vector<1x128xf32>
    %112 = arith.addf %110, %111 : vector<1x128xf32>
    %113 = math.tanh %112 : vector<1x128xf32>
    %114 = arith.mulf %106, %113 : vector<1x128xf32>
    %c0_64 = arith.constant 0 : index
    %c0_65 = arith.constant 0 : index
    %115 = vector.load %arg8[%c0_64, %c0_65] : memref<1x128xf32, #tpu.memory_space<vmem>>, vector<1x128xf32>
    tpu.vector_store %arg8[%c0_64, %c0_65], %112 {strides = array<i32>} : memref<1x128xf32, #tpu.memory_space<vmem>>, vector<1x128xf32>,
    %c0_66 = arith.constant 0 : index
    %c0_67 = arith.constant 0 : index
    %116 = vector.load %arg7[%c0_66, %c0_67] : memref<1x128xf32, #tpu.memory_space<vmem>>, vector<1x128xf32>
    tpu.vector_store %arg7[%c0_66, %c0_67], %114 {strides = array<i32>} : memref<1x128xf32, #tpu.memory_space<vmem>>, vector<1x128xf32>,
    %117 = arith.index_cast %c3_i32 : i32 to index
    %c0_68 = arith.constant 0 : index
    %118 = vector.load %arg10[%117, %c0_68] : memref<8x128xf32, #tpu.memory_space<vmem>>, vector<1x128xf32>
    tpu.vector_store %arg10[%117, %c0_68], %114 {strides = array<i32>} : memref<8x128xf32, #tpu.memory_space<vmem>>, vector<1x128xf32>,
    %c4_i32 = arith.constant 4 : i32
    %119 = arith.index_cast %c4_i32 : i32 to index
    %c0_69 = arith.constant 0 : index
    %120 = vector.load %arg9[%119, %c0_69] : memref<8x512xf32, #tpu.memory_space<vmem>>, vector<1x512xf32>
    %c0_70 = arith.constant 0 : index
    %c0_71 = arith.constant 0 : index
    %121 = vector.load %arg7[%c0_70, %c0_71] : memref<1x128xf32, #tpu.memory_space<vmem>>, vector<1x128xf32>
    %c0_72 = arith.constant 0 : index
    %c0_73 = arith.constant 0 : index
    %122 = vector.load %arg2[%c0_72, %c0_73] : memref<128x512xf32, #tpu.memory_space<vmem>>, vector<128x512xf32>
    %cst_74 = arith.constant dense<0.000000e+00> : vector<1x512xf32>
    %123 = tpu.matmul %121, %122, %cst_74 {dimension_numbers = #tpu.dot_dimension_numbers<[1], [0], [0], [1], [0, 0, 1, 1], [], []>} : vector<1x128xf32>, vector<128x512xf32>, vector<1x512xf32> -> vector<1x512xf32>
    %124 = arith.addf %120, %123 : vector<1x512xf32>
    %125 = vector.extract_strided_slice %124 {offsets = [0, 0], sizes = [1, 384], strides = [1, 1]} : vector<1x512xf32> to vector<1x384xf32>
    %126 = arith.negf %125 : vector<1x384xf32>
    %127 = math.exp %126 : vector<1x384xf32>
    %cst_75 = arith.constant 1.000000e+00 : f32
    %128 = vector.broadcast %cst_75 : f32 to vector<1x384xf32>
    %129 = arith.addf %128, %127 : vector<1x384xf32>
    %130 = arith.divf %128, %129 : vector<1x384xf32>
    %131 = vector.extract_strided_slice %130 {offsets = [0, 0], sizes = [1, 128], strides = [1, 1]} : vector<1x384xf32> to vector<1x128xf32>
    %132 = vector.extract_strided_slice %130 {offsets = [0, 128], sizes = [1, 128], strides = [1, 1]} : vector<1x384xf32> to vector<1x128xf32>
    %133 = vector.extract_strided_slice %130 {offsets = [0, 256], sizes = [1, 128], strides = [1, 1]} : vector<1x384xf32> to vector<1x128xf32>
    %134 = vector.extract_strided_slice %124 {offsets = [0, 384], sizes = [1, 128], strides = [1, 1]} : vector<1x512xf32> to vector<1x128xf32>
    %135 = math.tanh %134 : vector<1x128xf32>
    %c0_76 = arith.constant 0 : index
    %c0_77 = arith.constant 0 : index
    %136 = vector.load %arg8[%c0_76, %c0_77] : memref<1x128xf32, #tpu.memory_space<vmem>>, vector<1x128xf32>
    %137 = arith.mulf %132, %136 : vector<1x128xf32>
    %138 = arith.mulf %131, %135 : vector<1x128xf32>
    %139 = arith.addf %137, %138 : vector<1x128xf32>
    %140 = math.tanh %139 : vector<1x128xf32>
    %141 = arith.mulf %133, %140 : vector<1x128xf32>
    %c0_78 = arith.constant 0 : index
    %c0_79 = arith.constant 0 : index
    %142 = vector.load %arg8[%c0_78, %c0_79] : memref<1x128xf32, #tpu.memory_space<vmem>>, vector<1x128xf32>
    tpu.vector_store %arg8[%c0_78, %c0_79], %139 {strides = array<i32>} : memref<1x128xf32, #tpu.memory_space<vmem>>, vector<1x128xf32>,
    %c0_80 = arith.constant 0 : index
    %c0_81 = arith.constant 0 : index
    %143 = vector.load %arg7[%c0_80, %c0_81] : memref<1x128xf32, #tpu.memory_space<vmem>>, vector<1x128xf32>
    tpu.vector_store %arg7[%c0_80, %c0_81], %141 {strides = array<i32>} : memref<1x128xf32, #tpu.memory_space<vmem>>, vector<1x128xf32>,
    %144 = arith.index_cast %c4_i32 : i32 to index
    %c0_82 = arith.constant 0 : index
    %145 = vector.load %arg10[%144, %c0_82] : memref<8x128xf32, #tpu.memory_space<vmem>>, vector<1x128xf32>
    tpu.vector_store %arg10[%144, %c0_82], %141 {strides = array<i32>} : memref<8x128xf32, #tpu.memory_space<vmem>>, vector<1x128xf32>,
    %c5_i32 = arith.constant 5 : i32
    %146 = arith.index_cast %c5_i32 : i32 to index
    %c0_83 = arith.constant 0 : index
    %147 = vector.load %arg9[%146, %c0_83] : memref<8x512xf32, #tpu.memory_space<vmem>>, vector<1x512xf32>
    %c0_84 = arith.constant 0 : index
    %c0_85 = arith.constant 0 : index
    %148 = vector.load %arg7[%c0_84, %c0_85] : memref<1x128xf32, #tpu.memory_space<vmem>>, vector<1x128xf32>
    %c0_86 = arith.constant 0 : index
    %c0_87 = arith.constant 0 : index
    %149 = vector.load %arg2[%c0_86, %c0_87] : memref<128x512xf32, #tpu.memory_space<vmem>>, vector<128x512xf32>
    %cst_88 = arith.constant dense<0.000000e+00> : vector<1x512xf32>
    %150 = tpu.matmul %148, %149, %cst_88 {dimension_numbers = #tpu.dot_dimension_numbers<[1], [0], [0], [1], [0, 0, 1, 1], [], []>} : vector<1x128xf32>, vector<128x512xf32>, vector<1x512xf32> -> vector<1x512xf32>
    %151 = arith.addf %147, %150 : vector<1x512xf32>
    %152 = vector.extract_strided_slice %151 {offsets = [0, 0], sizes = [1, 384], strides = [1, 1]} : vector<1x512xf32> to vector<1x384xf32>
    %153 = arith.negf %152 : vector<1x384xf32>
    %154 = math.exp %153 : vector<1x384xf32>
    %cst_89 = arith.constant 1.000000e+00 : f32
    %155 = vector.broadcast %cst_89 : f32 to vector<1x384xf32>
    %156 = arith.addf %155, %154 : vector<1x384xf32>
    %157 = arith.divf %155, %156 : vector<1x384xf32>
    %158 = vector.extract_strided_slice %157 {offsets = [0, 0], sizes = [1, 128], strides = [1, 1]} : vector<1x384xf32> to vector<1x128xf32>
    %159 = vector.extract_strided_slice %157 {offsets = [0, 128], sizes = [1, 128], strides = [1, 1]} : vector<1x384xf32> to vector<1x128xf32>
    %160 = vector.extract_strided_slice %157 {offsets = [0, 256], sizes = [1, 128], strides = [1, 1]} : vector<1x384xf32> to vector<1x128xf32>
    %161 = vector.extract_strided_slice %151 {offsets = [0, 384], sizes = [1, 128], strides = [1, 1]} : vector<1x512xf32> to vector<1x128xf32>
    %162 = math.tanh %161 : vector<1x128xf32>
    %c0_90 = arith.constant 0 : index
    %c0_91 = arith.constant 0 : index
    %163 = vector.load %arg8[%c0_90, %c0_91] : memref<1x128xf32, #tpu.memory_space<vmem>>, vector<1x128xf32>
    %164 = arith.mulf %159, %163 : vector<1x128xf32>
    %165 = arith.mulf %158, %162 : vector<1x128xf32>
    %166 = arith.addf %164, %165 : vector<1x128xf32>
    %167 = math.tanh %166 : vector<1x128xf32>
    %168 = arith.mulf %160, %167 : vector<1x128xf32>
    %c0_92 = arith.constant 0 : index
    %c0_93 = arith.constant 0 : index
    %169 = vector.load %arg8[%c0_92, %c0_93] : memref<1x128xf32, #tpu.memory_space<vmem>>, vector<1x128xf32>
    tpu.vector_store %arg8[%c0_92, %c0_93], %166 {strides = array<i32>} : memref<1x128xf32, #tpu.memory_space<vmem>>, vector<1x128xf32>,
    %c0_94 = arith.constant 0 : index
    %c0_95 = arith.constant 0 : index
    %170 = vector.load %arg7[%c0_94, %c0_95] : memref<1x128xf32, #tpu.memory_space<vmem>>, vector<1x128xf32>
    tpu.vector_store %arg7[%c0_94, %c0_95], %168 {strides = array<i32>} : memref<1x128xf32, #tpu.memory_space<vmem>>, vector<1x128xf32>,
    %171 = arith.index_cast %c5_i32 : i32 to index
    %c0_96 = arith.constant 0 : index
    %172 = vector.load %arg10[%171, %c0_96] : memref<8x128xf32, #tpu.memory_space<vmem>>, vector<1x128xf32>
    tpu.vector_store %arg10[%171, %c0_96], %168 {strides = array<i32>} : memref<8x128xf32, #tpu.memory_space<vmem>>, vector<1x128xf32>,
    %c6_i32 = arith.constant 6 : i32
    %173 = arith.index_cast %c6_i32 : i32 to index
    %c0_97 = arith.constant 0 : index
    %174 = vector.load %arg9[%173, %c0_97] : memref<8x512xf32, #tpu.memory_space<vmem>>, vector<1x512xf32>
    %c0_98 = arith.constant 0 : index
    %c0_99 = arith.constant 0 : index
    %175 = vector.load %arg7[%c0_98, %c0_99] : memref<1x128xf32, #tpu.memory_space<vmem>>, vector<1x128xf32>
    %c0_100 = arith.constant 0 : index
    %c0_101 = arith.constant 0 : index
    %176 = vector.load %arg2[%c0_100, %c0_101] : memref<128x512xf32, #tpu.memory_space<vmem>>, vector<128x512xf32>
    %cst_102 = arith.constant dense<0.000000e+00> : vector<1x512xf32>
    %177 = tpu.matmul %175, %176, %cst_102 {dimension_numbers = #tpu.dot_dimension_numbers<[1], [0], [0], [1], [0, 0, 1, 1], [], []>} : vector<1x128xf32>, vector<128x512xf32>, vector<1x512xf32> -> vector<1x512xf32>
    %178 = arith.addf %174, %177 : vector<1x512xf32>
    %179 = vector.extract_strided_slice %178 {offsets = [0, 0], sizes = [1, 384], strides = [1, 1]} : vector<1x512xf32> to vector<1x384xf32>
    %180 = arith.negf %179 : vector<1x384xf32>
    %181 = math.exp %180 : vector<1x384xf32>
    %cst_103 = arith.constant 1.000000e+00 : f32
    %182 = vector.broadcast %cst_103 : f32 to vector<1x384xf32>
    %183 = arith.addf %182, %181 : vector<1x384xf32>
    %184 = arith.divf %182, %183 : vector<1x384xf32>
    %185 = vector.extract_strided_slice %184 {offsets = [0, 0], sizes = [1, 128], strides = [1, 1]} : vector<1x384xf32> to vector<1x128xf32>
    %186 = vector.extract_strided_slice %184 {offsets = [0, 128], sizes = [1, 128], strides = [1, 1]} : vector<1x384xf32> to vector<1x128xf32>
    %187 = vector.extract_strided_slice %184 {offsets = [0, 256], sizes = [1, 128], strides = [1, 1]} : vector<1x384xf32> to vector<1x128xf32>
    %188 = vector.extract_strided_slice %178 {offsets = [0, 384], sizes = [1, 128], strides = [1, 1]} : vector<1x512xf32> to vector<1x128xf32>
    %189 = math.tanh %188 : vector<1x128xf32>
    %c0_104 = arith.constant 0 : index
    %c0_105 = arith.constant 0 : index
    %190 = vector.load %arg8[%c0_104, %c0_105] : memref<1x128xf32, #tpu.memory_space<vmem>>, vector<1x128xf32>
    %191 = arith.mulf %186, %190 : vector<1x128xf32>
    %192 = arith.mulf %185, %189 : vector<1x128xf32>
    %193 = arith.addf %191, %192 : vector<1x128xf32>
    %194 = math.tanh %193 : vector<1x128xf32>
    %195 = arith.mulf %187, %194 : vector<1x128xf32>
    %c0_106 = arith.constant 0 : index
    %c0_107 = arith.constant 0 : index
    %196 = vector.load %arg8[%c0_106, %c0_107] : memref<1x128xf32, #tpu.memory_space<vmem>>, vector<1x128xf32>
    tpu.vector_store %arg8[%c0_106, %c0_107], %193 {strides = array<i32>} : memref<1x128xf32, #tpu.memory_space<vmem>>, vector<1x128xf32>,
    %c0_108 = arith.constant 0 : index
    %c0_109 = arith.constant 0 : index
    %197 = vector.load %arg7[%c0_108, %c0_109] : memref<1x128xf32, #tpu.memory_space<vmem>>, vector<1x128xf32>
    tpu.vector_store %arg7[%c0_108, %c0_109], %195 {strides = array<i32>} : memref<1x128xf32, #tpu.memory_space<vmem>>, vector<1x128xf32>,
    %198 = arith.index_cast %c6_i32 : i32 to index
    %c0_110 = arith.constant 0 : index
    %199 = vector.load %arg10[%198, %c0_110] : memref<8x128xf32, #tpu.memory_space<vmem>>, vector<1x128xf32>
    tpu.vector_store %arg10[%198, %c0_110], %195 {strides = array<i32>} : memref<8x128xf32, #tpu.memory_space<vmem>>, vector<1x128xf32>,
    %c7_i32 = arith.constant 7 : i32
    %200 = arith.index_cast %c7_i32 : i32 to index
    %c0_111 = arith.constant 0 : index
    %201 = vector.load %arg9[%200, %c0_111] : memref<8x512xf32, #tpu.memory_space<vmem>>, vector<1x512xf32>
    %c0_112 = arith.constant 0 : index
    %c0_113 = arith.constant 0 : index
    %202 = vector.load %arg7[%c0_112, %c0_113] : memref<1x128xf32, #tpu.memory_space<vmem>>, vector<1x128xf32>
    %c0_114 = arith.constant 0 : index
    %c0_115 = arith.constant 0 : index
    %203 = vector.load %arg2[%c0_114, %c0_115] : memref<128x512xf32, #tpu.memory_space<vmem>>, vector<128x512xf32>
    %cst_116 = arith.constant dense<0.000000e+00> : vector<1x512xf32>
    %204 = tpu.matmul %202, %203, %cst_116 {dimension_numbers = #tpu.dot_dimension_numbers<[1], [0], [0], [1], [0, 0, 1, 1], [], []>} : vector<1x128xf32>, vector<128x512xf32>, vector<1x512xf32> -> vector<1x512xf32>
    %205 = arith.addf %201, %204 : vector<1x512xf32>
    %206 = vector.extract_strided_slice %205 {offsets = [0, 0], sizes = [1, 384], strides = [1, 1]} : vector<1x512xf32> to vector<1x384xf32>
    %207 = arith.negf %206 : vector<1x384xf32>
    %208 = math.exp %207 : vector<1x384xf32>
    %cst_117 = arith.constant 1.000000e+00 : f32
    %209 = vector.broadcast %cst_117 : f32 to vector<1x384xf32>
    %210 = arith.addf %209, %208 : vector<1x384xf32>
    %211 = arith.divf %209, %210 : vector<1x384xf32>
    %212 = vector.extract_strided_slice %211 {offsets = [0, 0], sizes = [1, 128], strides = [1, 1]} : vector<1x384xf32> to vector<1x128xf32>
    %213 = vector.extract_strided_slice %211 {offsets = [0, 128], sizes = [1, 128], strides = [1, 1]} : vector<1x384xf32> to vector<1x128xf32>
    %214 = vector.extract_strided_slice %211 {offsets = [0, 256], sizes = [1, 128], strides = [1, 1]} : vector<1x384xf32> to vector<1x128xf32>
    %215 = vector.extract_strided_slice %205 {offsets = [0, 384], sizes = [1, 128], strides = [1, 1]} : vector<1x512xf32> to vector<1x128xf32>
    %216 = math.tanh %215 : vector<1x128xf32>
    %c0_118 = arith.constant 0 : index
    %c0_119 = arith.constant 0 : index
    %217 = vector.load %arg8[%c0_118, %c0_119] : memref<1x128xf32, #tpu.memory_space<vmem>>, vector<1x128xf32>
    %218 = arith.mulf %213, %217 : vector<1x128xf32>
    %219 = arith.mulf %212, %216 : vector<1x128xf32>
    %220 = arith.addf %218, %219 : vector<1x128xf32>
    %221 = math.tanh %220 : vector<1x128xf32>
    %222 = arith.mulf %214, %221 : vector<1x128xf32>
    %c0_120 = arith.constant 0 : index
    %c0_121 = arith.constant 0 : index
    %223 = vector.load %arg8[%c0_120, %c0_121] : memref<1x128xf32, #tpu.memory_space<vmem>>, vector<1x128xf32>
    tpu.vector_store %arg8[%c0_120, %c0_121], %220 {strides = array<i32>} : memref<1x128xf32, #tpu.memory_space<vmem>>, vector<1x128xf32>,
    %c0_122 = arith.constant 0 : index
    %c0_123 = arith.constant 0 : index
    %224 = vector.load %arg7[%c0_122, %c0_123] : memref<1x128xf32, #tpu.memory_space<vmem>>, vector<1x128xf32>
    tpu.vector_store %arg7[%c0_122, %c0_123], %222 {strides = array<i32>} : memref<1x128xf32, #tpu.memory_space<vmem>>, vector<1x128xf32>,
    %225 = arith.index_cast %c7_i32 : i32 to index
    %c0_124 = arith.constant 0 : index
    %226 = vector.load %arg10[%225, %c0_124] : memref<8x128xf32, #tpu.memory_space<vmem>>, vector<1x128xf32>
    tpu.vector_store %arg10[%225, %c0_124], %222 {strides = array<i32>} : memref<8x128xf32, #tpu.memory_space<vmem>>, vector<1x128xf32>,
    %c8_i32 = arith.constant 8 : i32
    %c0_125 = arith.constant 0 : index
    %c0_126 = arith.constant 0 : index
    %227 = vector.load %arg10[%c0_125, %c0_126] : memref<8x128xf32, #tpu.memory_space<vmem>>, vector<8x128xf32>
    %c0_127 = arith.constant 0 : index
    %c0_128 = arith.constant 0 : index
    %228 = vector.load %arg4[%c0_127, %c0_128] : memref<128x128xf32, #tpu.memory_space<vmem>>, vector<128x128xf32>
    %cst_129 = arith.constant dense<0.000000e+00> : vector<8x128xf32>
    %229 = tpu.matmul %227, %228, %cst_129 {dimension_numbers = #tpu.dot_dimension_numbers<[1], [0], [0], [1], [0, 0, 1, 1], [], []>} : vector<8x128xf32>, vector<128x128xf32>, vector<8x128xf32> -> vector<8x128xf32>
    %c0_130 = arith.constant 0 : index
    %c0_131 = arith.constant 0 : index
    %230 = vector.load %arg5[%c0_130, %c0_131] : memref<1x128xf32, #tpu.memory_space<vmem>>, vector<1x128xf32>
    %231 = vector.broadcast %230 : vector<1x128xf32> to vector<8x128xf32>
    %232 = arith.addf %229, %231 : vector<8x128xf32>
    %c0_132 = arith.constant 0 : index
    %c0_133 = arith.constant 0 : index
    %233 = vector.load %arg6[%c0_132, %c0_133] : memref<8x128xf32, #tpu.memory_space<vmem>>, vector<8x128xf32>
    tpu.vector_store %arg6[%c0_132, %c0_133], %232 {strides = array<i32>} : memref<8x128xf32, #tpu.memory_space<vmem>>, vector<8x128xf32>,
    return
  }
}

</mosaic_0001>

<bundles_post_ra>
// kernel: tpu_custom_call.1
= control target key start
LH: loop header
LB: loop body
LE: loop exit
PB: predicated region body
PF: predicated region fallthrough
CT: control target
= control target key end

     0   :  { %11 = vsyncpa [#allocation7], 0  ;;  %s3585_s0 = inlined_call_operand.hbm [shape: f32[8,8], index: 0, kind: input, shape index: {}]   ;;  %s3586_s1 = inlined_call_operand.hbm [shape: f32[8,512], index: 1, kind: input, shape index: {}]   ;;  %s3587_s2 = inlined_call_operand.hbm [shape: f32[128,512], index: 2, kind: input, shape index: {}]   ;;  %s3588_s3 = inlined_call_operand.vmem [shape: f32[1,512], index: 3, kind: input, shape index: {}]   ;;  %s3589_s4 = inlined_call_operand.hbm [shape: f32[128,128], index: 4, kind: input, shape index: {}]   ;;  %s3590_s5 = inlined_call_operand.vmem [shape: f32[1,128], index: 5, kind: input, shape index: {}]   ;;  %s3591_s6 = inlined_call_operand.hbm [shape: f32[8,128], index: 6, kind: output, shape index: {}]  }
   0x1   :  { %12 = vsyncpa [#allocation10], 0 }
   0x2   :  { %13 = vsyncpa [#allocation13], 0 }
   0x3   :  { %14 = vsyncpa [#allocation8], 0  ;;  %s2716_s21 = smov [#allocation9]   ;;  %s2717_s23 = smov [#allocation6]  }
   0x4   :  { %s31_s22 = sshll.u32 %s2716_s21, 4  ;;  %s21_s24 = sshll.u32 %s2717_s23, 4  ;;  %s32_s22 = int_to_ptr.vmem [resolvable:$true] %s31_s22  ;;  %s22_s24 = int_to_ptr.vmem [resolvable:$true] %s21_s24 }
   0x5   :  { %s2616_s25 = scalar_lea.vmem %s32_s22, 512  ;;  %p2621_p1 = scmp.lt.s32.totalorder %s32_s22, %s32_s22 }
   0x6   :  { %p2617_p0 = scmp.ne.s32.totalorder %s32_s22, %s2616_s25  ;;  %p2622_p2 = scmp.lt.s32.totalorder %s2616_s25, %s2616_s25 }
   0x8   :  { %p2623_p3 = por %p2622_p2, %p2621_p1 }
   0xa   :  { %p2624_p4 = pnand %p2623_p3, %p2617_p0 }
   0xc   :  { %2627 = shalt.err (!%p2624_p4)
}
   0xd   :  { %34 = dma.hbm_to_vmem [thread:$0]  %s3586_s1, 512, %s32_s22, [#allocation10]  }
   0xe   :  { %s2636_s28 = scalar_lea.vmem %s22_s24, 128  ;;  %p2641_p6 = scmp.lt.s32.totalorder %s22_s24, %s22_s24 }
   0xf   :  { %p2637_p5 = scmp.ne.s32.totalorder %s22_s24, %s2636_s28  ;;  %p2642_p7 = scmp.lt.s32.totalorder %s2636_s28, %s2636_s28 }
  0x11   :  { %p2643_p8 = por %p2642_p7, %p2641_p6 }
  0x13   :  { %p2644_p9 = pnand %p2643_p8, %p2637_p5 }
  0x15   :  { %2647 = shalt.err (!%p2644_p9)
}
  0x16   :  { %24 = dma.hbm_to_vmem [thread:$0]  %s3585_s0, 128, %s22_s24, [#allocation7]  }
  0x17   :  { %s2718_s7 = smov [#allocation11]  }
  0x18   :  { %s40_s8 = sshll.u32 %s2718_s7, 4  ;;  %s41_s8 = int_to_ptr.vmem [resolvable:$true] %s40_s8 }
  0x19   :  { %s2656_s9 = scalar_lea.vmem %s41_s8, 8192  ;;  %p2661_p11 = scmp.lt.s32.totalorder %s41_s8, %s41_s8 }
  0x1a   :  { %p2657_p10 = scmp.ne.s32.totalorder %s41_s8, %s2656_s9  ;;  %p2662_p12 = scmp.lt.s32.totalorder %s2656_s9, %s2656_s9 }
  0x1c   :  { %p2663_p13 = por %p2662_p12, %p2661_p11 }
  0x1e   :  { %p2664_p0 = pnand %p2663_p13, %p2657_p10 }
  0x20   :  { %2667 = shalt.err (!%p2664_p0)
}
  0x21   :  { %s2719_s1 = smov 512   ;;  %s2720_s10 = smov 32  }
  0x22   :  { %46 = dma.hbm_to_vmem [thread:$0]  %s3587_s2, 8192, %s41_s8, [#allocation10], %s2719_s1, %s2719_s1, %s2720_s10  }
  0x23   :  { %s2721_s13 = smov [#allocation12]  }
  0x24   :  { %s54_s14 = sshll.u32 %s2721_s13, 4  ;;  %s55_s14 = int_to_ptr.vmem [resolvable:$true] %s54_s14 }
  0x25   :  { %s2676_s0 = scalar_lea.vmem %s55_s14, 2048  ;;  %p2681_p2 = scmp.lt.s32.totalorder %s55_s14, %s55_s14 }
  0x26   :  { %p2677_p1 = scmp.ne.s32.totalorder %s55_s14, %s2676_s0  ;;  %p2682_p3 = scmp.lt.s32.totalorder %s2676_s0, %s2676_s0 }
  0x28   :  { %p2683_p4 = por %p2682_p3, %p2681_p2 }
  0x2a   :  { %p2684_p5 = pnand %p2683_p4, %p2677_p1 }
  0x2c   :  { %2687 = shalt.err (!%p2684_p5)
}
  0x2d   :  { %s2722_s15 = smov 128   ;;  %s2723_s16 = smov 8  }
  0x2e   :  { %60 = dma.hbm_to_vmem [thread:$0]  %s3589_s4, 2048, %s55_s14, [#allocation13], %s2722_s15, %s2722_s15, %s2723_s16  }
  0x2f   :  { %2708 = dma.done.wait [#allocation7], 128  }
  0x30   :  { %2709 = vsyncadd [#allocation7], 4294967168 }
  0x31   :  { %2710 = dma.done.wait [#allocation10], 8704  }
  0x32   :  { %2711 = vsyncadd [#allocation10], 4294958592 }
  0x33   :  { %2712 = dma.done.wait [#allocation13], 2048  }
  0x34   :  { %2713 = vsyncadd [#allocation13], 4294965248  ;;  %v3592_v0 = vmov 0.0   ;;  %v77_v1 = vld [vmem:[#allocation9 + $0x8] sm:$0xff]  ;;  %v76_v2 = vld [vmem:[#allocation9] sm:$0xff]  ;;  %vm102_vm0 = vcmask 64512  }
  0x35   :  { %170 = vmatprep.mubr.f32.mxu1 %v3592_v0  ;;  %252 = vst [vmem:[#allocation2] sm:$0x1] %v3592_v0  ;;  %253 = vst [vmem:[#allocation3] sm:$0x1] %v3592_v0  ;;  %384 = vmatprep.mubr.f32.mxu0 %v3592_v0  ;;  %v75_v3 = vld [vmem:[#allocation6] sm:$0xff]  ;;  %v78_v5 = vld [vmem:[#allocation9 + $0x10] sm:$0xff] }
  0x36   :  { %136 = vmatprep.subr.mxu1 %v77_v1  ;;  %v79_v4 = vld [vmem:[#allocation9 + $0x18] sm:$0xff]  ;;  %v2779_v6 = vld [vmem:[#allocation11 + $0x1e8] sm:$0xff]  ;;  %v2782_v7 = vld [vmem:[#allocation11 + $0x1e0] sm:$0xff]  ;;  %vm2726_vm1 = vmmov 0   ;;  %s2727_s20 = smov [#allocation14]  }
  0x37   :  { %137 = vmatpush1.msra.mxu1 %v76_v2  ;;  %320 = vmatprep.subr.mxu0 %v2779_v6  ;;  %v2784_v8 = vld [vmem:[#allocation11 + $0x1f8] sm:$0xff]  ;;  %v2787_v9 = vld [vmem:[#allocation11 + $0x1c8] sm:$0xff]  ;;  %v2790_v10 = vld [vmem:[#allocation11 + $0x1c0] sm:$0xff]  ;;  %s2458_s21 = sshll.u32 %s2727_s20, 4  ;;  %s2459_s21 = int_to_ptr.vmem [resolvable:$true] %s2458_s21 }
  0x38   :  { %3669 = vst [vmem:[#allocation19_spill] sm:$0xff] %v2784_v8  ;;  %2469 = vmatmul.mubr.msk.f32.vlgmr.msra.gmra.mxu1 %vm102_vm0, %v75_v3  ;;  %207 = vmatprep.subr.mxu1 %v79_v4  ;;  %v2794_v11 = vld [vmem:[#allocation11 + $0x1f0] sm:$0xff]  ;;  %v2796_v12 = vld [vmem:[#allocation11 + $0x1a8] sm:$0xff]  ;;  %v2799_v13 = vld [vmem:[#allocation11 + $0x1d8] sm:$0xff]  ;;  %s2688_s22 = scalar_lea.vmem %s2459_s21, 128  ;;  %p2693_p7 = scmp.lt.s32.totalorder %s2459_s21, %s2459_s21 }
  0x39   :  { %208 = vmatpush1.msra.mxu1 %v78_v5  ;;  %241 = vmatprep.mubr.f32.mxu1 %v3592_v0  ;;  %v2801_v14 = vld [vmem:[#allocation11 + $0x1a0] sm:$0xff]  ;;  %v2805_v15 = vld [vmem:[#allocation11 + $0x1d0] sm:$0xff]  ;;  %v2807_v16 = vld [vmem:[#allocation11 + $0x188] sm:$0xff]  ;;  %p2689_p6 = scmp.ne.s32.totalorder %s2459_s21, %s2688_s22  ;;  %p2694_p8 = scmp.lt.s32.totalorder %s2688_s22, %s2688_s22 }
  0x3a   :  { %321 = vmatpush1.msra.mxu0 %v2782_v7  ;;  %391 = vmatprep.subr.mxu1 %v2784_v8  ;;  %v2811_v17 = vld [vmem:[#allocation11 + $0x1b8] sm:$0xff]  ;;  %v2813_v18 = vld [vmem:[#allocation11 + $0x180] sm:$0xff]  ;;  %v2817_v19 = vld [vmem:[#allocation11 + $0x1b0] sm:$0xff] }
  0x3b   :  { %322 = vmatprep.subr.mxu0 %v2787_v9  ;;  %v2819_v20 = vld [vmem:[#allocation11 + $0x168] sm:$0xff]  ;;  %v2823_v21 = vld [vmem:[#allocation11 + $0x198] sm:$0xff]  ;;  %v2825_v22 = vld [vmem:[#allocation11 + $0x160] sm:$0xff]  ;;  %p2695_p9 = por %p2694_p8, %p2693_p7 }
  0x3c   :  { %2470 = vmatmul.mubr.msk.f32.vlgmr.msra.gmra.mxu1 %vm102_vm0, %v75_v3  ;;  %323 = vmatpush1.msra.mxu0 %v2790_v10  ;;  %v2829_v23 = vld [vmem:[#allocation11 + $0x190] sm:$0xff]  ;;  %v2831_v24 = vld [vmem:[#allocation11 + $0x148] sm:$0xff]  ;;  %v2835_v25 = vld [vmem:[#allocation11 + $0x178] sm:$0xff] }
  0x3d   :  { %392 = vmatpush1.msra.mxu1 %v2794_v11  ;;  %324 = vmatprep.subr.mxu0 %v2796_v12  ;;  %v2837_v26 = vld [vmem:[#allocation11 + $0x140] sm:$0xff]  ;;  %v2841_v27 = vld [vmem:[#allocation11 + $0x170] sm:$0xff]  ;;  %v2843_v28 = vld [vmem:[#allocation11 + $0x128] sm:$0xff]  ;;  %p2696_p10 = pnand %p2695_p9, %p2689_p6 }
  0x3e   :  { %393 = vmatprep.subr.mxu1 %v2799_v13  ;;  %325 = vmatpush1.msra.mxu0 %v2801_v14  ;;  %v2847_v29 = vld [vmem:[#allocation11 + $0x158] sm:$0xff]  ;;  %v2849_v30 = vld [vmem:[#allocation11 + $0x120] sm:$0xff]  ;;  %v2853_v31 = vld [vmem:[#allocation11 + $0x150] sm:$0xff] }
  0x3f   :  { %394 = vmatpush1.msra.mxu1 %v2805_v15  ;;  %326 = vmatprep.subr.mxu0 %v2807_v16  ;;  %v2855_v32 = vld [vmem:[#allocation11 + $0x108] sm:$0xff]  ;;  %v2859_v33 = vld [vmem:[#allocation11 + $0x138] sm:$0xff]  ;;  %v2861_v34 = vld [vmem:[#allocation11 + $0x100] sm:$0xff] }
  0x40   :  { %395 = vmatprep.subr.mxu1 %v2811_v17  ;;  %327 = vmatpush1.msra.mxu0 %v2813_v18  ;;  %v2865_v35 = vld [vmem:[#allocation11 + $0x130] sm:$0xff]  ;;  %v2867_v36 = vld [vmem:[#allocation11 + $0xe8] sm:$0xff]  ;;  %v2871_v37 = vld [vmem:[#allocation11 + $0x118] sm:$0xff] }
  0x41   :  { %396 = vmatpush1.msra.mxu1 %v2817_v19  ;;  %328 = vmatprep.subr.mxu0 %v2819_v20  ;;  %v2873_v38 = vld [vmem:[#allocation11 + $0xe0] sm:$0xff]  ;;  %v2877_v39 = vld [vmem:[#allocation11 + $0x110] sm:$0xff]  ;;  %v2879_v40 = vld [vmem:[#allocation11 + $0xc8] sm:$0xff] }
  0x42   :  { %397 = vmatprep.subr.mxu1 %v2823_v21  ;;  %329 = vmatpush1.msra.mxu0 %v2825_v22  ;;  %v2883_v41 = vld [vmem:[#allocation11 + $0xf8] sm:$0xff]  ;;  %v2885_v42 = vld [vmem:[#allocation11 + $0xc0] sm:$0xff]  ;;  %v2889_v43 = vld [vmem:[#allocation11 + $0xf0] sm:$0xff] }
  0x43   :  { %398 = vmatpush1.msra.mxu1 %v2829_v23  ;;  %330 = vmatprep.subr.mxu0 %v2831_v24  ;;  %v2891_v44 = vld [vmem:[#allocation11 + $0xa8] sm:$0xff]  ;;  %v2895_v45 = vld [vmem:[#allocation11 + $0xd8] sm:$0xff]  ;;  %v2897_v46 = vld [vmem:[#allocation11 + $0xa0] sm:$0xff] }
  0x44   :  { %399 = vmatprep.subr.mxu1 %v2835_v25  ;;  %331 = vmatpush1.msra.mxu0 %v2837_v26  ;;  %v2901_v47 = vld [vmem:[#allocation11 + $0xd0] sm:$0xff]  ;;  %v2903_v48 = vld [vmem:[#allocation11 + $0x88] sm:$0xff]  ;;  %v2907_v49 = vld [vmem:[#allocation11 + $0xb8] sm:$0xff] }
  0x45   :  { %400 = vmatpush1.msra.mxu1 %v2841_v27  ;;  %332 = vmatprep.subr.mxu0 %v2843_v28  ;;  %3670 = vst [vmem:[#allocation20_spill] sm:$0xff] %v2903_v48  ;;  %v2909_v50 = vld [vmem:[#allocation11 + $0x80] sm:$0xff]  ;;  %v2913_v51 = vld [vmem:[#allocation11 + $0xb0] sm:$0xff]  ;;  %v2915_v52 = vld [vmem:[#allocation11 + $0x68] sm:$0xff] }
  0x46   :  { %401 = vmatprep.subr.mxu1 %v2847_v29  ;;  %333 = vmatpush1.msra.mxu0 %v2849_v30  ;;  %3671 = vst [vmem:[#allocation21_spill] sm:$0xff] %v2909_v50  ;;  %3672 = vst [vmem:[#allocation22_spill] sm:$0xff] %v2913_v51  ;;  %v2919_v53 = vld [vmem:[#allocation11 + $0x98] sm:$0xff]  ;;  %v2921_v54 = vld [vmem:[#allocation11 + $0x60] sm:$0xff] }
  0x47   :  { %402 = vmatpush1.msra.mxu1 %v2853_v31  ;;  %334 = vmatprep.subr.mxu0 %v2855_v32  ;;  %3673 = vst [vmem:[#allocation23_spill] sm:$0xff] %v2915_v52  ;;  %3674 = vst [vmem:[#allocation24_spill] sm:$0xff] %v2919_v53  ;;  %v2925_v55 = vld [vmem:[#allocation11 + $0x90] sm:$0xff]  ;;  %v2927_v56 = vld [vmem:[#allocation11 + $0x48] sm:$0xff] }
  0x48   :  { %403 = vmatprep.subr.mxu1 %v2859_v33  ;;  %335 = vmatpush1.msra.mxu0 %v2861_v34  ;;  %3675 = vst [vmem:[#allocation25_spill] sm:$0xff] %v2921_v54  ;;  %3676 = vst [vmem:[#allocation26_spill] sm:$0xff] %v2925_v55  ;;  %v2931_v57 = vld [vmem:[#allocation11 + $0x78] sm:$0xff]  ;;  %v2933_v58 = vld [vmem:[#allocation11 + $0x40] sm:$0xff] }
  0x49   :  { %404 = vmatpush1.msra.mxu1 %v2865_v35  ;;  %336 = vmatprep.subr.mxu0 %v2867_v36  ;;  %3677 = vst [vmem:[#allocation27_spill] sm:$0xff] %v2927_v56  ;;  %3678 = vst [vmem:[#allocation28_spill] sm:$0xff] %v2931_v57  ;;  %v2937_v59 = vld [vmem:[#allocation11 + $0x70] sm:$0xff]  ;;  %v2939_v60 = vld [vmem:[#allocation11 + $0x28] sm:$0xff] }
  0x4a   :  { %405 = vmatprep.subr.mxu1 %v2871_v37  ;;  %337 = vmatpush1.msra.mxu0 %v2873_v38  ;;  %3679 = vst [vmem:[#allocation29_spill] sm:$0xff] %v2933_v58  ;;  %3680 = vst [vmem:[#allocation30_spill] sm:$0xff] %v2937_v59  ;;  %v2943_v61 = vld [vmem:[#allocation11 + $0x58] sm:$0xff]  ;;  %v2945_v62 = vld [vmem:[#allocation11 + $0x20] sm:$0xff] }
  0x4b   :  { %406 = vmatpush1.msra.mxu1 %v2877_v39  ;;  %338 = vmatprep.subr.mxu0 %v2879_v40  ;;  %3681 = vst [vmem:[#allocation31_spill] sm:$0xff] %v2939_v60  ;;  %3682 = vst [vmem:[#allocation32_spill] sm:$0xff] %v2943_v61  ;;  %v2949_v63 = vld [vmem:[#allocation11 + $0x50] sm:$0xff]  ;;  %v2951_v1 = vld [vmem:[#allocation11 + $0x8] sm:$0xff] }
  0x4c   :  { %407 = vmatprep.subr.mxu1 %v2883_v41  ;;  %339 = vmatpush1.msra.mxu0 %v2885_v42  ;;  %3683 = vst [vmem:[#allocation33_spill] sm:$0xff] %v2945_v62  ;;  %3684 = vst [vmem:[#allocation34_spill] sm:$0xff] %v2949_v63  ;;  %v2955_v2 = vld [vmem:[#allocation11 + $0x38] sm:$0xff]  ;;  %v2957_v3 = vld [vmem:[#allocation11] sm:$0xff] }
  0x4d   :  { %408 = vmatpush1.msra.mxu1 %v2889_v43  ;;  %340 = vmatprep.subr.mxu0 %v2891_v44  ;;  %3685 = vst [vmem:[#allocation35_spill] sm:$0xff] %v2951_v1  ;;  %3686 = vst [vmem:[#allocation36_spill] sm:$0xff] %v2955_v2  ;;  %v2961_v4 = vld [vmem:[#allocation11 + $0x30] sm:$0xff]  ;;  %v255_v5 = vld [vmem:[#allocation2] sm:$0x1] }
  0x4e   :  { %409 = vmatprep.subr.mxu1 %v2895_v45  ;;  %341 = vmatpush1.msra.mxu0 %v2897_v46  ;;  %3687 = vst [vmem:[#allocation37_spill] sm:$0xff] %v2957_v3  ;;  %3688 = vst [vmem:[#allocation38_spill] sm:$0xff] %v2961_v4  ;;  %v2965_v0 = vld [vmem:[#allocation11 + $0x18] sm:$0xff] }
  0x4f   :  { %410 = vmatpush1.msra.mxu1 %v2901_v47  ;;  %342 = vmatprep.subr.mxu0 %v2903_v48  ;;  %3689 = vst [vmem:[#allocation39_spill] sm:$0xff] %v2965_v0 }
  0x50   :  { %411 = vmatprep.subr.mxu1 %v2907_v49  ;;  %343 = vmatpush1.msra.mxu0 %v2909_v50 }
  0x51   :  { %412 = vmatpush1.msra.mxu1 %v2913_v51  ;;  %344 = vmatprep.subr.mxu0 %v2915_v52 }
  0x52   :  { %413 = vmatprep.subr.mxu1 %v2919_v53  ;;  %345 = vmatpush1.msra.mxu0 %v2921_v54 }
  0x53   :  { %414 = vmatpush1.msra.mxu1 %v2925_v55  ;;  %346 = vmatprep.subr.mxu0 %v2927_v56 }
  0x54   :  { %415 = vmatprep.subr.mxu1 %v2931_v57  ;;  %347 = vmatpush1.msra.mxu0 %v2933_v58 }
  0x55   :  { %416 = vmatpush1.msra.mxu1 %v2937_v59  ;;  %348 = vmatprep.subr.mxu0 %v2939_v60  ;;  %v2969_v60 = vld [vmem:[#allocation11 + $0x10] sm:$0xff] }
  0x56   :  { %417 = vmatprep.subr.mxu1 %v2943_v61  ;;  %349 = vmatpush1.msra.mxu0 %v2945_v62  ;;  %3690 = vst [vmem:[#allocation40_spill] sm:$0xff] %v2969_v60  ;;  %v3691_v62 = vmov 0.0  }
  0x57   :  { %418 = vmatpush1.msra.mxu1 %v2949_v63  ;;  %350 = vmatprep.subr.mxu0 %v2951_v1 }
  0x58   :  { %419 = vmatprep.subr.mxu1 %v2955_v2  ;;  %351 = vmatpush1.msra.mxu0 %v2957_v3 }
  0x59   :  { %420 = vmatpush1.msra.mxu1 %v2961_v4  ;;  %385 = vmatmul.mubr.f32.vlgmr.msra.gmra.mxu0 %v255_v5 }
  0x5a   :  { %421 = vmatprep.subr.mxu1 %v2965_v0  ;;  %455 = vmatprep.mubr.f32.mxu1 %v3691_v62 }
  0x5b   :  { %422 = vmatpush1.msra.mxu1 %v2969_v60  ;;  %583 = vmatprep.subr.mxu0 %v2779_v6 }
  0x5c   :  { %456 = vmatmul.mubr.f32.vlgmr.msra.gmra.mxu1 %v255_v5  ;;  %654 = vmatprep.subr.mxu1 %v2784_v8  ;;  %v3692_v5 = vld [vmem:[#allocation31_spill] sm:$0xff] }
  0x5d   :  { %584 = vmatpush1.msra.mxu0 %v2782_v7  ;;  %655 = vmatpush1.msra.mxu1 %v2794_v11 }
  0x5e   :  { %585 = vmatprep.subr.mxu0 %v2787_v9  ;;  %656 = vmatprep.subr.mxu1 %v2799_v13 }
  0x5f   :  { %586 = vmatpush1.msra.mxu0 %v2790_v10  ;;  %657 = vmatpush1.msra.mxu1 %v2805_v15 }
  0x60   :  { %587 = vmatprep.subr.mxu0 %v2796_v12  ;;  %658 = vmatprep.subr.mxu1 %v2811_v17 }
  0x61   :  { %588 = vmatpush1.msra.mxu0 %v2801_v14  ;;  %659 = vmatpush1.msra.mxu1 %v2817_v19 }
  0x62   :  { %589 = vmatprep.subr.mxu0 %v2807_v16  ;;  %660 = vmatprep.subr.mxu1 %v2823_v21 }
  0x63   :  { %590 = vmatpush1.msra.mxu0 %v2813_v18  ;;  %661 = vmatpush1.msra.mxu1 %v2829_v23 }
  0x64   :  { %591 = vmatprep.subr.mxu0 %v2819_v20  ;;  %662 = vmatprep.subr.mxu1 %v2835_v25 }
  0x65   :  { %592 = vmatpush1.msra.mxu0 %v2825_v22  ;;  %663 = vmatpush1.msra.mxu1 %v2841_v27 }
  0x66   :  { %593 = vmatprep.subr.mxu0 %v2831_v24  ;;  %664 = vmatprep.subr.mxu1 %v2847_v29 }
  0x67   :  { %594 = vmatpush1.msra.mxu0 %v2837_v26  ;;  %665 = vmatpush1.msra.mxu1 %v2853_v31 }
  0x68   :  { %595 = vmatprep.subr.mxu0 %v2843_v28  ;;  %666 = vmatprep.subr.mxu1 %v2859_v33 }
  0x69   :  { %596 = vmatpush1.msra.mxu0 %v2849_v30  ;;  %667 = vmatpush1.msra.mxu1 %v2865_v35 }
  0x6a   :  { %597 = vmatprep.subr.mxu0 %v2855_v32  ;;  %668 = vmatprep.subr.mxu1 %v2871_v37 }
  0x6b   :  { %598 = vmatpush1.msra.mxu0 %v2861_v34  ;;  %669 = vmatpush1.msra.mxu1 %v2877_v39 }
  0x6c   :  { %599 = vmatprep.subr.mxu0 %v2867_v36  ;;  %670 = vmatprep.subr.mxu1 %v2883_v41 }
  0x6d   :  { %600 = vmatpush1.msra.mxu0 %v2873_v38  ;;  %671 = vmatpush1.msra.mxu1 %v2889_v43 }
  0x6e   :  { %601 = vmatprep.subr.mxu0 %v2879_v40  ;;  %672 = vmatprep.subr.mxu1 %v2895_v45 }
  0x6f   :  { %602 = vmatpush1.msra.mxu0 %v2885_v42  ;;  %673 = vmatpush1.msra.mxu1 %v2901_v47 }
  0x70   :  { %603 = vmatprep.subr.mxu0 %v2891_v44  ;;  %674 = vmatprep.subr.mxu1 %v2907_v49 }
  0x71   :  { %604 = vmatpush1.msra.mxu0 %v2897_v46  ;;  %675 = vmatpush1.msra.mxu1 %v2913_v51 }
  0x72   :  { %605 = vmatprep.subr.mxu0 %v2903_v48  ;;  %676 = vmatprep.subr.mxu1 %v2919_v53 }
  0x73   :  { %606 = vmatpush1.msra.mxu0 %v2909_v50  ;;  %677 = vmatpush1.msra.mxu1 %v2925_v55  ;;  %v3693_v55 = vld [vmem:[#allocation33_spill] sm:$0xff] }
  0x74   :  { %607 = vmatprep.subr.mxu0 %v2915_v52  ;;  %678 = vmatprep.subr.mxu1 %v2931_v57  ;;  %v2725_v52 = vmov 1966171168  }
  0x75   :  { %608 = vmatpush1.msra.mxu0 %v2921_v54  ;;  %679 = vmatpush1.msra.mxu1 %v2937_v59  ;;  %v469_v50 = vunpack.c.l.s4 %v2725_v52 }
  0x76   :  { %609 = vmatprep.subr.mxu0 %v2927_v56  ;;  %680 = vmatprep.subr.mxu1 %v2943_v61 }
  0x77   :  { %610 = vmatpush1.msra.mxu0 %v2933_v58  ;;  %681 = vmatpush1.msra.mxu1 %v2949_v63 }
  0x78   :  { %611 = vmatprep.subr.mxu0 %v3692_v5  ;;  %682 = vmatprep.subr.mxu1 %v2955_v2  ;;  %v82_v2 = vlaneseq }
  0x79   :  { %612 = vmatpush1.msra.mxu0 %v3693_v55  ;;  %683 = vmatpush1.msra.mxu1 %v2961_v4 }
  0x7a   :  { %613 = vmatprep.subr.mxu0 %v2951_v1  ;;  %684 = vmatprep.subr.mxu1 %v2965_v0  ;;  %v83_v55 = vshrl.u32 %v82_v2, 7  ;;  %v80_v1 = vld [vmem:[%s3588_s3] sm:$0xf] }
  0x7b   :  { %614 = vmatpush1.msra.mxu0 %v2957_v3  ;;  %647 = vmatprep.mubr.f32.mxu0 %v3691_v62 }
  0x7c   :  { %685 = vmatpush1.msra.mxu1 %v2969_v60  ;;  %718 = vmatprep.mubr.f32.mxu1 %v3691_v62  ;;  %v84_v5 = vsub.s32 0, %v83_v55  ;;  %v88_v0 = vsub.s32 1, %v83_v55  ;;  %v92_v3 = vsub.s32 2, %v83_v55  ;;  %v96_v58 = vsub.s32 3, %v83_v55 }
  0x7d   :  { %846 = vmatprep.subr.mxu0 %v2779_v6  ;;  %917 = vmatprep.subr.mxu1 %v2784_v8 }
  0x7e   :  { %v85_v4 = vrot.slane %v80_v1, %v84_v5  ;;  %v89_v63 = vrot.slane %v80_v1, %v88_v0  ;;  %v93_v56 = vrot.slane %v80_v1, %v92_v3  ;;  %v97_v59 = vrot.slane %v80_v1, %v96_v58 }
  0x7f   :  { %v470_v5 = vunpack.c.0.s8 %v469_v50 }
  0x81   :  { %v3046_v51 = vsub.s32 %v470_v5, %v83_v55 }
  0xf8   :  { %v172_v61 = vpop.f32.mrf.mxu1 }
  0xf9   :  { %v173_v60 = vadd.f32 %v172_v61, %v85_v4 }
  0xfa   :  { %v174_v62 = vpop.f32.mrf.mxu1 }
  0xfb   :  { %248 = vst [vmem:[#allocation4] sm:$0xff] %v173_v60  ;;  %v175_v6 = vadd.f32 %v174_v62, %v89_v63 }
  0xfc   :  { %v243_v8 = vpop.f32.mrf.mxu1 }
  0xfd   :  { %249 = vst [vmem:[#allocation4 + $0x8] sm:$0xff] %v175_v6  ;;  %v244_v2 = vadd.f32 %v243_v8, %v93_v56 }
  0xfe   :  { %v245_v54 = vpop.f32.mrf.mxu1 }
  0xff   :  { %250 = vst [vmem:[#allocation4 + $0x10] sm:$0xff] %v244_v2  ;;  %v246_v57 = vadd.f32 %v245_v54, %v97_v59 }
 0x101   :  { %251 = vst [vmem:[#allocation4 + $0x18] sm:$0xff] %v246_v57 }
 0x108   :  { %v254_v54 = vld [vmem:[#allocation4] ss:$8 sm:$0xf] }
 0x119   :  { %v386_v53 = vpop.f32.mrf.mxu0 }
 0x11b   :  { %v388_v0 = vpop.f32.mrf.mxu0 }
 0x11c   :  { %v457_v48 = vpop.f32.mrf.mxu1  ;;  %v466_v61 = vcombine.low %v386_v53, %v388_v0  ;;  %v502_v53 = vld [vmem:[#allocation3] sm:$0x1] }
 0x11e   :  { %v459_v3 = vpop.f32.mrf.mxu1  ;;  %v474_v58 = vrot.slane %v466_v61, %v3046_v51 }
 0x11f   :  { %v467_v60 = vcombine.low %v457_v48, %v459_v3 }
 0x121   :  { %v481_v62 = vrot.slane %v467_v60, %v3046_v51  ;;  %v3715_v60 = vld [vmem:[#allocation40_spill] sm:$0xff] }
 0x123   :  { %v482_v8 = vcombine.low %v474_v58, %v481_v62  ;;  %v3716_v58 = vld [vmem:[#allocation19_spill] sm:$0xff] }
 0x125   :  { %v489_v56 = vrot.slane %v482_v8, %v3046_v51 }
 0x127   :  { %v491_v57 = vadd.f32 %v489_v56, %v254_v54 }
 0x129   :  { %v2471_v59 = vmul.f32 -1.442695, %v491_v57  ;;  %v499_v63 = vrot.slane %v491_v57, 3 }
 0x12b   :  { %2544 = vpow2.f32 %v2471_v59 }
 0x138   :  { %v2545_v50 = vpop.eup %2544 }
 0x139   :  { %v495_v52 = vadd.f32 1.0, %v2545_v50 }
 0x13b   :  { %2546 = vrcp.f32 %v495_v52 }
 0x13c   :  { %2548 = vtanh.f32 %v499_v63 }
 0x148   :  { %v2547_v55 = vpop.eup %2546 }
 0x149   :  { %v504_v1 = vrot.slane %v2547_v55, 1  ;;  %v2549_v48 = vpop.eup %2548  ;;  %v510_v5 = vrot.slane %v2547_v55, 2 }
 0x14a   :  { %v507_v6 = vmul.f32 %v2549_v48, %v2547_v55 }
 0x14b   :  { %v506_v4 = vmul.f32 %v504_v1, %v502_v53  ;;  %v517_v53 = vld [vmem:[#allocation4 + $0x1] ss:$8 sm:$0xf] }
 0x14d   :  { %v508_v2 = vadd.f32 %v507_v6, %v506_v4 }
 0x14f   :  { %2550 = vtanh.f32 %v508_v2  ;;  %513 = vst [vmem:[#allocation3] sm:$0x1] %v508_v2 }
 0x15c   :  { %v2551_v0 = vpop.eup %2550 }
 0x15d   :  { %v512_v61 = vmul.f32 %v2551_v0, %v510_v5 }
 0x15f   :  { %514 = vst [vmem:[#allocation2] sm:$0x1] %v512_v61  ;;  %515 = vst [vmem:[#allocation5] sm:$0x1] %v512_v61 }
 0x166   :  { %v518_v3 = vld [vmem:[#allocation2] sm:$0x1] }
 0x167   :  { %648 = vmatmul.mubr.f32.vlgmr.msra.gmra.mxu0 %v518_v3  ;;  %719 = vmatmul.mubr.f32.vlgmr.msra.gmra.mxu1 %v518_v3  ;;  %v765_v3 = vld [vmem:[#allocation3] sm:$0x1] }
 0x168   :  { %847 = vmatpush1.msra.mxu0 %v2782_v7  ;;  %918 = vmatpush1.msra.mxu1 %v2794_v11  ;;  %v3694_v7 = vld [vmem:[#allocation22_spill] sm:$0xff] }
 0x169   :  { %848 = vmatprep.subr.mxu0 %v2787_v9  ;;  %919 = vmatprep.subr.mxu1 %v2799_v13  ;;  %v3695_v9 = vld [vmem:[#allocation20_spill] sm:$0xff] }
 0x16a   :  { %849 = vmatpush1.msra.mxu0 %v2790_v10  ;;  %920 = vmatpush1.msra.mxu1 %v2805_v15  ;;  %v3696_v10 = vld [vmem:[#allocation24_spill] sm:$0xff] }
 0x16b   :  { %850 = vmatprep.subr.mxu0 %v2796_v12  ;;  %921 = vmatprep.subr.mxu1 %v2811_v17  ;;  %v3697_v12 = vld [vmem:[#allocation21_spill] sm:$0xff] }
 0x16c   :  { %851 = vmatpush1.msra.mxu0 %v2801_v14  ;;  %922 = vmatpush1.msra.mxu1 %v2817_v19  ;;  %v3698_v14 = vld [vmem:[#allocation26_spill] sm:$0xff] }
 0x16d   :  { %852 = vmatprep.subr.mxu0 %v2807_v16  ;;  %923 = vmatprep.subr.mxu1 %v2823_v21  ;;  %v3699_v16 = vld [vmem:[#allocation23_spill] sm:$0xff] }
 0x16e   :  { %853 = vmatpush1.msra.mxu0 %v2813_v18  ;;  %924 = vmatpush1.msra.mxu1 %v2829_v23  ;;  %v3700_v18 = vld [vmem:[#allocation28_spill] sm:$0xff] }
 0x16f   :  { %854 = vmatprep.subr.mxu0 %v2819_v20  ;;  %925 = vmatprep.subr.mxu1 %v2835_v25  ;;  %v3701_v20 = vld [vmem:[#allocation25_spill] sm:$0xff] }
 0x170   :  { %855 = vmatpush1.msra.mxu0 %v2825_v22  ;;  %926 = vmatpush1.msra.mxu1 %v2841_v27  ;;  %v3702_v22 = vld [vmem:[#allocation30_spill] sm:$0xff] }
 0x171   :  { %856 = vmatprep.subr.mxu0 %v2831_v24  ;;  %927 = vmatprep.subr.mxu1 %v2847_v29  ;;  %v3703_v24 = vld [vmem:[#allocation27_spill] sm:$0xff] }
 0x172   :  { %857 = vmatpush1.msra.mxu0 %v2837_v26  ;;  %928 = vmatpush1.msra.mxu1 %v2853_v31  ;;  %v3704_v26 = vld [vmem:[#allocation32_spill] sm:$0xff] }
 0x173   :  { %858 = vmatprep.subr.mxu0 %v2843_v28  ;;  %929 = vmatprep.subr.mxu1 %v2859_v33  ;;  %v3705_v28 = vld [vmem:[#allocation29_spill] sm:$0xff] }
 0x174   :  { %859 = vmatpush1.msra.mxu0 %v2849_v30  ;;  %930 = vmatpush1.msra.mxu1 %v2865_v35  ;;  %v3706_v30 = vld [vmem:[#allocation34_spill] sm:$0xff] }
 0x175   :  { %860 = vmatprep.subr.mxu0 %v2855_v32  ;;  %931 = vmatprep.subr.mxu1 %v2871_v37  ;;  %v3707_v32 = vld [vmem:[#allocation31_spill] sm:$0xff] }
 0x176   :  { %861 = vmatpush1.msra.mxu0 %v2861_v34  ;;  %932 = vmatpush1.msra.mxu1 %v2877_v39  ;;  %v3708_v34 = vld [vmem:[#allocation36_spill] sm:$0xff] }
 0x177   :  { %862 = vmatprep.subr.mxu0 %v2867_v36  ;;  %933 = vmatprep.subr.mxu1 %v2883_v41  ;;  %v3709_v36 = vld [vmem:[#allocation33_spill] sm:$0xff] }
 0x178   :  { %863 = vmatpush1.msra.mxu0 %v2873_v38  ;;  %934 = vmatpush1.msra.mxu1 %v2889_v43  ;;  %v3710_v38 = vld [vmem:[#allocation38_spill] sm:$0xff] }
 0x179   :  { %864 = vmatprep.subr.mxu0 %v2879_v40  ;;  %935 = vmatprep.subr.mxu1 %v2895_v45  ;;  %v3711_v40 = vld [vmem:[#allocation35_spill] sm:$0xff] }
 0x17a   :  { %865 = vmatpush1.msra.mxu0 %v2885_v42  ;;  %936 = vmatpush1.msra.mxu1 %v2901_v47  ;;  %v3712_v42 = vld [vmem:[#allocation39_spill] sm:$0xff] }
 0x17b   :  { %866 = vmatprep.subr.mxu0 %v2891_v44  ;;  %937 = vmatprep.subr.mxu1 %v2907_v49  ;;  %v3713_v44 = vld [vmem:[#allocation37_spill] sm:$0xff] }
 0x17c   :  { %867 = vmatpush1.msra.mxu0 %v2897_v46  ;;  %938 = vmatpush1.msra.mxu1 %v3694_v7  ;;  %v3714_v46 = vmov 0.0  }
 0x17d   :  { %868 = vmatprep.subr.mxu0 %v3695_v9  ;;  %939 = vmatprep.subr.mxu1 %v3696_v10 }
 0x17e   :  { %869 = vmatpush1.msra.mxu0 %v3697_v12  ;;  %940 = vmatpush1.msra.mxu1 %v3698_v14 }
 0x17f   :  { %870 = vmatprep.subr.mxu0 %v3699_v16  ;;  %941 = vmatprep.subr.mxu1 %v3700_v18 }
 0x180   :  { %871 = vmatpush1.msra.mxu0 %v3701_v20  ;;  %942 = vmatpush1.msra.mxu1 %v3702_v22 }
 0x181   :  { %872 = vmatprep.subr.mxu0 %v3703_v24  ;;  %943 = vmatprep.subr.mxu1 %v3704_v26 }
 0x182   :  { %873 = vmatpush1.msra.mxu0 %v3705_v28  ;;  %944 = vmatpush1.msra.mxu1 %v3706_v30 }
 0x183   :  { %874 = vmatprep.subr.mxu0 %v3707_v32  ;;  %945 = vmatprep.subr.mxu1 %v3708_v34 }
 0x184   :  { %875 = vmatpush1.msra.mxu0 %v3709_v36  ;;  %946 = vmatpush1.msra.mxu1 %v3710_v38  ;;  %v3234_v36 = vld [vmem:[#allocation11 + $0x28] sm:$0xff] }
 0x185   :  { %876 = vmatprep.subr.mxu0 %v3711_v40  ;;  %947 = vmatprep.subr.mxu1 %v3712_v42  ;;  %3722 = vst [vmem:[#allocation23_spill] sm:$0xff] %v3234_v36  ;;  %v3240_v40 = vld [vmem:[#allocation11 + $0x8] sm:$0xff] }
 0x186   :  { %877 = vmatpush1.msra.mxu0 %v3713_v44  ;;  %910 = vmatprep.mubr.f32.mxu0 %v3714_v46  ;;  %3724 = vst [vmem:[#allocation25_spill] sm:$0xff] %v3240_v40 }
 0x187   :  { %948 = vmatpush1.msra.mxu1 %v3715_v60  ;;  %981 = vmatprep.mubr.f32.mxu1 %v3714_v46 }
 0x188   :  { %1180 = vmatprep.subr.mxu1 %v3716_v58 }
 0x227   :  { %v649_v62 = vpop.f32.mrf.mxu0  ;;  %v720_v8 = vpop.f32.mrf.mxu1 }
 0x229   :  { %v651_v56 = vpop.f32.mrf.mxu0  ;;  %v722_v54 = vpop.f32.mrf.mxu1 }
 0x22a   :  { %v729_v57 = vcombine.low %v649_v62, %v651_v56  ;;  %v730_v59 = vcombine.low %v720_v8, %v722_v54 }
 0x22c   :  { %v737_v50 = vrot.slane %v729_v57, %v3046_v51  ;;  %v744_v52 = vrot.slane %v730_v59, %v3046_v51 }
 0x22e   :  { %v745_v63 = vcombine.low %v737_v50, %v744_v52  ;;  %v780_v52 = vld [vmem:[#allocation4 + $0x2] ss:$8 sm:$0xf] }
 0x230   :  { %v752_v55 = vrot.slane %v745_v63, %v3046_v51 }
 0x232   :  { %v754_v1 = vadd.f32 %v752_v55, %v517_v53 }
 0x234   :  { %v2472_v48 = vmul.f32 -1.442695, %v754_v1  ;;  %v762_v2 = vrot.slane %v754_v1, 3 }
 0x236   :  { %2552 = vpow2.f32 %v2472_v48 }
 0x243   :  { %v2553_v4 = vpop.eup %2552 }
 0x244   :  { %v758_v6 = vadd.f32 1.0, %v2553_v4 }
 0x246   :  { %2554 = vrcp.f32 %v758_v6 }
 0x247   :  { %2556 = vtanh.f32 %v762_v2 }
 0x253   :  { %v2555_v5 = vpop.eup %2554 }
 0x254   :  { %v767_v0 = vrot.slane %v2555_v5, 1  ;;  %v2557_v61 = vpop.eup %2556  ;;  %v773_v20 = vrot.slane %v2555_v5, 2 }
 0x255   :  { %v770_v12 = vmul.f32 %v2557_v61, %v2555_v5 }
 0x256   :  { %v769_v9 = vmul.f32 %v767_v0, %v765_v3 }
 0x258   :  { %v771_v16 = vadd.f32 %v770_v12, %v769_v9 }
 0x25a   :  { %2558 = vtanh.f32 %v771_v16  ;;  %776 = vst [vmem:[#allocation3] sm:$0x1] %v771_v16 }
 0x261   :  { %v1028_v5 = vld [vmem:[#allocation3] sm:$0x1] }
 0x267   :  { %v2559_v24 = vpop.eup %2558 }
 0x268   :  { %v775_v28 = vmul.f32 %v2559_v24, %v773_v20  ;;  %v3286_v24 = vld [vmem:[#allocation11 + $0x1f8] sm:$0xff] }
 0x269   :  { %3726 = vst [vmem:[#allocation27_spill] sm:$0xff] %v3286_v24 }
 0x26a   :  { %777 = vst [vmem:[#allocation2] sm:$0x1] %v775_v28  ;;  %778 = vst [vmem:[#allocation5 + $0x1] sm:$0x1] %v775_v28  ;;  %v3289_v28 = vld [vmem:[#allocation11 + $0x1f0] sm:$0xff] }
 0x271   :  { %v781_v32 = vld [vmem:[#allocation2] sm:$0x1] }
 0x272   :  { %911 = vmatmul.mubr.f32.vlgmr.msra.gmra.mxu0 %v781_v32  ;;  %982 = vmatmul.mubr.f32.vlgmr.msra.gmra.mxu1 %v781_v32  ;;  %v3292_v32 = vld [vmem:[#allocation11 + $0x1d8] sm:$0xff] }
 0x273   :  { %1181 = vmatpush1.msra.mxu1 %v2794_v11  ;;  %1173 = vmatprep.mubr.f32.mxu0 %v3714_v46  ;;  %v3152_v11 = vld [vmem:[#allocation11 + $0x1e8] sm:$0xff] }
 0x274   :  { %1182 = vmatprep.subr.mxu1 %v2799_v13  ;;  %1244 = vmatprep.mubr.f32.mxu1 %v3714_v46  ;;  %3717 = vst [vmem:[#allocation22_spill] sm:$0xff] %v3152_v11  ;;  %v3155_v13 = vld [vmem:[#allocation11 + $0x1e0] sm:$0xff] }
 0x275   :  { %1183 = vmatpush1.msra.mxu1 %v2805_v15  ;;  %1109 = vmatprep.subr.mxu0 %v3152_v11  ;;  %v3158_v15 = vld [vmem:[#allocation11 + $0x1c8] sm:$0xff] }
 0x276   :  { %1184 = vmatprep.subr.mxu1 %v2811_v17  ;;  %1110 = vmatpush1.msra.mxu0 %v3155_v13  ;;  %v3161_v17 = vld [vmem:[#allocation11 + $0x1c0] sm:$0xff] }
 0x277   :  { %1185 = vmatpush1.msra.mxu1 %v2817_v19  ;;  %1111 = vmatprep.subr.mxu0 %v3158_v15  ;;  %v3164_v19 = vld [vmem:[#allocation11 + $0x1a8] sm:$0xff] }
 0x278   :  { %1186 = vmatprep.subr.mxu1 %v2823_v21  ;;  %1112 = vmatpush1.msra.mxu0 %v3161_v17  ;;  %v3167_v21 = vld [vmem:[#allocation11 + $0x1a0] sm:$0xff] }
 0x279   :  { %1187 = vmatpush1.msra.mxu1 %v2829_v23  ;;  %1113 = vmatprep.subr.mxu0 %v3164_v19  ;;  %v3170_v23 = vld [vmem:[#allocation11 + $0x188] sm:$0xff] }
 0x27a   :  { %1188 = vmatprep.subr.mxu1 %v2835_v25  ;;  %1114 = vmatpush1.msra.mxu0 %v3167_v21  ;;  %v3173_v25 = vld [vmem:[#allocation11 + $0x180] sm:$0xff] }
 0x27b   :  { %1189 = vmatpush1.msra.mxu1 %v2841_v27  ;;  %1115 = vmatprep.subr.mxu0 %v3170_v23  ;;  %v3176_v27 = vld [vmem:[#allocation11 + $0x168] sm:$0xff] }
 0x27c   :  { %1190 = vmatprep.subr.mxu1 %v2847_v29  ;;  %1116 = vmatpush1.msra.mxu0 %v3173_v25  ;;  %v3179_v29 = vld [vmem:[#allocation11 + $0x160] sm:$0xff] }
 0x27d   :  { %1191 = vmatpush1.msra.mxu1 %v2853_v31  ;;  %1117 = vmatprep.subr.mxu0 %v3176_v27  ;;  %v3182_v31 = vld [vmem:[#allocation11 + $0x148] sm:$0xff] }
 0x27e   :  { %1192 = vmatprep.subr.mxu1 %v2859_v33  ;;  %1118 = vmatpush1.msra.mxu0 %v3179_v29  ;;  %v3185_v33 = vld [vmem:[#allocation11 + $0x140] sm:$0xff] }
 0x27f   :  { %1193 = vmatpush1.msra.mxu1 %v2865_v35  ;;  %1119 = vmatprep.subr.mxu0 %v3182_v31  ;;  %v3188_v35 = vld [vmem:[#allocation11 + $0x128] sm:$0xff] }
 0x280   :  { %1194 = vmatprep.subr.mxu1 %v2871_v37  ;;  %1120 = vmatpush1.msra.mxu0 %v3185_v33  ;;  %v3191_v37 = vld [vmem:[#allocation11 + $0x120] sm:$0xff] }
 0x281   :  { %1195 = vmatpush1.msra.mxu1 %v2877_v39  ;;  %1121 = vmatprep.subr.mxu0 %v3188_v35  ;;  %v3194_v39 = vld [vmem:[#allocation11 + $0x108] sm:$0xff] }
 0x282   :  { %1196 = vmatprep.subr.mxu1 %v2883_v41  ;;  %1122 = vmatpush1.msra.mxu0 %v3191_v37  ;;  %v3197_v41 = vld [vmem:[#allocation11 + $0x100] sm:$0xff] }
 0x283   :  { %1197 = vmatpush1.msra.mxu1 %v2889_v43  ;;  %1123 = vmatprep.subr.mxu0 %v3194_v39  ;;  %v3200_v43 = vld [vmem:[#allocation11 + $0xe8] sm:$0xff] }
 0x284   :  { %1198 = vmatprep.subr.mxu1 %v2895_v45  ;;  %1124 = vmatpush1.msra.mxu0 %v3197_v41  ;;  %v3203_v45 = vld [vmem:[#allocation11 + $0xe0] sm:$0xff] }
 0x285   :  { %1199 = vmatpush1.msra.mxu1 %v2901_v47  ;;  %1125 = vmatprep.subr.mxu0 %v3200_v43  ;;  %v3206_v47 = vld [vmem:[#allocation11 + $0xc8] sm:$0xff] }
 0x286   :  { %1200 = vmatprep.subr.mxu1 %v2907_v49  ;;  %1126 = vmatpush1.msra.mxu0 %v3203_v45  ;;  %v3209_v49 = vld [vmem:[#allocation11 + $0xc0] sm:$0xff] }
 0x287   :  { %1201 = vmatpush1.msra.mxu1 %v3694_v7  ;;  %1127 = vmatprep.subr.mxu0 %v3206_v47  ;;  %v3212_v7 = vld [vmem:[#allocation11 + $0xa8] sm:$0xff] }
 0x288   :  { %1202 = vmatprep.subr.mxu1 %v3696_v10  ;;  %1128 = vmatpush1.msra.mxu0 %v3209_v49  ;;  %v3215_v10 = vld [vmem:[#allocation11 + $0xa0] sm:$0xff] }
 0x289   :  { %1203 = vmatpush1.msra.mxu1 %v3698_v14  ;;  %1129 = vmatprep.subr.mxu0 %v3212_v7  ;;  %v3218_v14 = vld [vmem:[#allocation11 + $0x88] sm:$0xff] }
 0x28a   :  { %1204 = vmatprep.subr.mxu1 %v3700_v18  ;;  %1130 = vmatpush1.msra.mxu0 %v3215_v10  ;;  %v3221_v18 = vld [vmem:[#allocation11 + $0x80] sm:$0xff] }
 0x28b   :  { %1205 = vmatpush1.msra.mxu1 %v3702_v22  ;;  %1131 = vmatprep.subr.mxu0 %v3218_v14  ;;  %v3224_v22 = vld [vmem:[#allocation11 + $0x68] sm:$0xff] }
 0x28c   :  { %1206 = vmatprep.subr.mxu1 %v3704_v26  ;;  %1132 = vmatpush1.msra.mxu0 %v3221_v18  ;;  %3718 = vst [vmem:[#allocation20_spill] sm:$0xff] %v3224_v22  ;;  %v3226_v26 = vld [vmem:[#allocation11 + $0x60] sm:$0xff] }
 0x28d   :  { %1207 = vmatpush1.msra.mxu1 %v3706_v30  ;;  %3719 = vst [vmem:[#allocation24_spill] sm:$0xff] %v3226_v26  ;;  %v3228_v30 = vld [vmem:[#allocation11 + $0x48] sm:$0xff]  ;;  %1133 = vmatprep.subr.mxu0 %v3224_v22 }
 0x28e   :  { %1208 = vmatprep.subr.mxu1 %v3708_v34  ;;  %3720 = vst [vmem:[#allocation21_spill] sm:$0xff] %v3228_v30  ;;  %v3231_v34 = vld [vmem:[#allocation11 + $0x40] sm:$0xff]  ;;  %1134 = vmatpush1.msra.mxu0 %v3226_v26 }
 0x28f   :  { %1209 = vmatpush1.msra.mxu1 %v3710_v38  ;;  %3721 = vst [vmem:[#allocation26_spill] sm:$0xff] %v3231_v34  ;;  %1135 = vmatprep.subr.mxu0 %v3228_v30  ;;  %v3237_v38 = vld [vmem:[#allocation11 + $0x20] sm:$0xff] }
 0x290   :  { %1210 = vmatprep.subr.mxu1 %v3712_v42  ;;  %3723 = vst [vmem:[#allocation28_spill] sm:$0xff] %v3237_v38  ;;  %1136 = vmatpush1.msra.mxu0 %v3231_v34  ;;  %v3243_v42 = vld [vmem:[#allocation11] sm:$0xff] }
 0x291   :  { %1211 = vmatpush1.msra.mxu1 %v3715_v60  ;;  %1137 = vmatprep.subr.mxu0 %v3234_v36  ;;  %3725 = vst [vmem:[#allocation30_spill] sm:$0xff] %v3243_v42 }
 0x292   :  { %1138 = vmatpush1.msra.mxu0 %v3237_v38  ;;  %1443 = vmatprep.subr.mxu1 %v3286_v24 }
 0x293   :  { %1139 = vmatprep.subr.mxu0 %v3240_v40 }
 0x294   :  { %1140 = vmatpush1.msra.mxu0 %v3243_v42 }
 0x295   :  { %1372 = vmatprep.subr.mxu0 %v3152_v11 }
 0x332   :  { %v912_v44 = vpop.f32.mrf.mxu0  ;;  %v983_v60 = vpop.f32.mrf.mxu1 }
 0x334   :  { %v914_v58 = vpop.f32.mrf.mxu0  ;;  %v985_v62 = vpop.f32.mrf.mxu1 }
 0x335   :  { %v992_v8 = vcombine.low %v912_v44, %v914_v58  ;;  %v993_v56 = vcombine.low %v983_v60, %v985_v62  ;;  %v3295_v44 = vld [vmem:[#allocation11 + $0x1d0] sm:$0xff]  ;;  %v3298_v60 = vld [vmem:[#allocation11 + $0x1b8] sm:$0xff] }
 0x336   :  { %v3301_v58 = vld [vmem:[#allocation11 + $0x1b0] sm:$0xff]  ;;  %v3304_v62 = vld [vmem:[#allocation11 + $0x198] sm:$0xff] }
 0x337   :  { %v1000_v54 = vrot.slane %v992_v8, %v3046_v51  ;;  %v1007_v57 = vrot.slane %v993_v56, %v3046_v51  ;;  %v3307_v8 = vld [vmem:[#allocation11 + $0x190] sm:$0xff]  ;;  %v3310_v56 = vld [vmem:[#allocation11 + $0x178] sm:$0xff] }
 0x339   :  { %v1008_v59 = vcombine.low %v1000_v54, %v1007_v57  ;;  %v3313_v54 = vld [vmem:[#allocation11 + $0x170] sm:$0xff]  ;;  %v3316_v57 = vld [vmem:[#allocation11 + $0x158] sm:$0xff] }
 0x33b   :  { %v1015_v50 = vrot.slane %v1008_v59, %v3046_v51  ;;  %v3319_v59 = vld [vmem:[#allocation11 + $0x150] sm:$0xff] }
 0x33d   :  { %v1017_v63 = vadd.f32 %v1015_v50, %v780_v52  ;;  %v3322_v50 = vld [vmem:[#allocation11 + $0x138] sm:$0xff]  ;;  %v3325_v52 = vld [vmem:[#allocation11 + $0x130] sm:$0xff] }
 0x33f   :  { %v2473_v55 = vmul.f32 -1.442695, %v1017_v63  ;;  %v1025_v48 = vrot.slane %v1017_v63, 3  ;;  %v3328_v63 = vld [vmem:[#allocation11 + $0x118] sm:$0xff] }
 0x341   :  { %2560 = vpow2.f32 %v2473_v55  ;;  %v3331_v55 = vld [vmem:[#allocation11 + $0x110] sm:$0xff] }
 0x34e   :  { %v2561_v53 = vpop.eup %2560 }
 0x34f   :  { %v1021_v1 = vadd.f32 1.0, %v2561_v53  ;;  %v3334_v53 = vld [vmem:[#allocation11 + $0xf8] sm:$0xff] }
 0x351   :  { %2562 = vrcp.f32 %v1021_v1  ;;  %v3337_v1 = vld [vmem:[#allocation11 + $0xf0] sm:$0xff] }
 0x352   :  { %2564 = vtanh.f32 %v1025_v48  ;;  %v3340_v48 = vld [vmem:[#allocation11 + $0xd8] sm:$0xff] }
 0x35e   :  { %v2563_v4 = vpop.eup %2562 }
 0x35f   :  { %v1030_v6 = vrot.slane %v2563_v4, 1  ;;  %v2565_v2 = vpop.eup %2564  ;;  %v1036_v9 = vrot.slane %v2563_v4, 2 }
 0x360   :  { %v1033_v61 = vmul.f32 %v2565_v2, %v2563_v4  ;;  %v3343_v4 = vld [vmem:[#allocation11 + $0xd0] sm:$0xff] }
 0x361   :  { %v1032_v0 = vmul.f32 %v1030_v6, %v1028_v5  ;;  %v3346_v6 = vld [vmem:[#allocation11 + $0xb8] sm:$0xff]  ;;  %v3349_v2 = vld [vmem:[#allocation11 + $0xb0] sm:$0xff] }
 0x362   :  { %v3352_v5 = vld [vmem:[#allocation11 + $0x98] sm:$0xff] }
 0x363   :  { %v1034_v3 = vadd.f32 %v1033_v61, %v1032_v0  ;;  %v3355_v0 = vld [vmem:[#allocation11 + $0x90] sm:$0xff]  ;;  %v3358_v61 = vld [vmem:[#allocation11 + $0x78] sm:$0xff] }
 0x364   :  { %3727 = vst [vmem:[#allocation32_spill] sm:$0xff] %v3355_v0  ;;  %3728 = vst [vmem:[#allocation29_spill] sm:$0xff] %v3358_v61 }
 0x365   :  { %2566 = vtanh.f32 %v1034_v3  ;;  %1039 = vst [vmem:[#allocation3] sm:$0x1] %v1034_v3  ;;  %v3360_v3 = vld [vmem:[#allocation11 + $0x70] sm:$0xff] }
 0x366   :  { %3729 = vst [vmem:[#allocation34_spill] sm:$0xff] %v3360_v3 }
 0x372   :  { %v2567_v12 = vpop.eup %2566 }
 0x373   :  { %v1038_v16 = vmul.f32 %v2567_v12, %v1036_v9  ;;  %v3362_v9 = vld [vmem:[#allocation11 + $0x58] sm:$0xff]  ;;  %v3365_v12 = vld [vmem:[#allocation11 + $0x50] sm:$0xff] }
 0x374   :  { %3730 = vst [vmem:[#allocation31_spill] sm:$0xff] %v3362_v9  ;;  %3731 = vst [vmem:[#allocation36_spill] sm:$0xff] %v3365_v12 }
 0x375   :  { %1040 = vst [vmem:[#allocation2] sm:$0x1] %v1038_v16  ;;  %1041 = vst [vmem:[#allocation5 + $0x2] sm:$0x1] %v1038_v16  ;;  %v3368_v16 = vld [vmem:[#allocation11 + $0x38] sm:$0xff] }
 0x376   :  { %3732 = vst [vmem:[#allocation33_spill] sm:$0xff] %v3368_v16 }
 0x37c   :  { %v1044_v20 = vld [vmem:[#allocation2] sm:$0x1] }
 0x37d   :  { %1174 = vmatmul.mubr.f32.vlgmr.msra.gmra.mxu0 %v1044_v20  ;;  %1245 = vmatmul.mubr.f32.vlgmr.msra.gmra.mxu1 %v1044_v20  ;;  %v3371_v20 = vld [vmem:[#allocation11 + $0x30] sm:$0xff] }
 0x37e   :  { %1373 = vmatpush1.msra.mxu0 %v3155_v13  ;;  %1436 = vmatprep.mubr.f32.mxu0 %v3714_v46  ;;  %3733 = vst [vmem:[#allocation38_spill] sm:$0xff] %v3371_v20 }
 0x37f   :  { %1374 = vmatprep.subr.mxu0 %v3158_v15  ;;  %1507 = vmatprep.mubr.f32.mxu1 %v3714_v46  ;;  %v3377_v46 = vld [vmem:[#allocation11 + $0x10] sm:$0xff] }
 0x380   :  { %1375 = vmatpush1.msra.mxu0 %v3161_v17  ;;  %1444 = vmatpush1.msra.mxu1 %v3289_v28  ;;  %3735 = vst [vmem:[#allocation39_spill] sm:$0xff] %v3377_v46 }
 0x381   :  { %1376 = vmatprep.subr.mxu0 %v3164_v19  ;;  %1445 = vmatprep.subr.mxu1 %v3292_v32 }
 0x382   :  { %1377 = vmatpush1.msra.mxu0 %v3167_v21  ;;  %1446 = vmatpush1.msra.mxu1 %v3295_v44 }
 0x383   :  { %1378 = vmatprep.subr.mxu0 %v3170_v23  ;;  %1447 = vmatprep.subr.mxu1 %v3298_v60 }
 0x384   :  { %1379 = vmatpush1.msra.mxu0 %v3173_v25  ;;  %1448 = vmatpush1.msra.mxu1 %v3301_v58 }
 0x385   :  { %1380 = vmatprep.subr.mxu0 %v3176_v27  ;;  %1449 = vmatprep.subr.mxu1 %v3304_v62 }
 0x386   :  { %1381 = vmatpush1.msra.mxu0 %v3179_v29  ;;  %1450 = vmatpush1.msra.mxu1 %v3307_v8 }
 0x387   :  { %1382 = vmatprep.subr.mxu0 %v3182_v31  ;;  %1451 = vmatprep.subr.mxu1 %v3310_v56 }
 0x388   :  { %1383 = vmatpush1.msra.mxu0 %v3185_v33  ;;  %1452 = vmatpush1.msra.mxu1 %v3313_v54 }
 0x389   :  { %1384 = vmatprep.subr.mxu0 %v3188_v35  ;;  %1453 = vmatprep.subr.mxu1 %v3316_v57 }
 0x38a   :  { %1385 = vmatpush1.msra.mxu0 %v3191_v37  ;;  %1454 = vmatpush1.msra.mxu1 %v3319_v59 }
 0x38b   :  { %1386 = vmatprep.subr.mxu0 %v3194_v39  ;;  %1455 = vmatprep.subr.mxu1 %v3322_v50 }
 0x38c   :  { %1387 = vmatpush1.msra.mxu0 %v3197_v41  ;;  %1456 = vmatpush1.msra.mxu1 %v3325_v52 }
 0x38d   :  { %1388 = vmatprep.subr.mxu0 %v3200_v43  ;;  %1457 = vmatprep.subr.mxu1 %v3328_v63 }
 0x38e   :  { %1389 = vmatpush1.msra.mxu0 %v3203_v45  ;;  %1458 = vmatpush1.msra.mxu1 %v3331_v55 }
 0x38f   :  { %1390 = vmatprep.subr.mxu0 %v3206_v47  ;;  %1459 = vmatprep.subr.mxu1 %v3334_v53 }
 0x390   :  { %1391 = vmatpush1.msra.mxu0 %v3209_v49  ;;  %1460 = vmatpush1.msra.mxu1 %v3337_v1 }
 0x391   :  { %1392 = vmatprep.subr.mxu0 %v3212_v7  ;;  %1461 = vmatprep.subr.mxu1 %v3340_v48 }
 0x392   :  { %1393 = vmatpush1.msra.mxu0 %v3215_v10  ;;  %1462 = vmatpush1.msra.mxu1 %v3343_v4 }
 0x393   :  { %1394 = vmatprep.subr.mxu0 %v3218_v14  ;;  %1463 = vmatprep.subr.mxu1 %v3346_v6 }
 0x394   :  { %1395 = vmatpush1.msra.mxu0 %v3221_v18  ;;  %1464 = vmatpush1.msra.mxu1 %v3349_v2 }
 0x395   :  { %1396 = vmatprep.subr.mxu0 %v3224_v22  ;;  %1465 = vmatprep.subr.mxu1 %v3352_v5 }
 0x396   :  { %1397 = vmatpush1.msra.mxu0 %v3226_v26  ;;  %1466 = vmatpush1.msra.mxu1 %v3355_v0 }
 0x397   :  { %1398 = vmatprep.subr.mxu0 %v3228_v30  ;;  %1467 = vmatprep.subr.mxu1 %v3358_v61 }
 0x398   :  { %1399 = vmatpush1.msra.mxu0 %v3231_v34  ;;  %1468 = vmatpush1.msra.mxu1 %v3360_v3 }
 0x399   :  { %1400 = vmatprep.subr.mxu0 %v3234_v36  ;;  %1469 = vmatprep.subr.mxu1 %v3362_v9 }
 0x39a   :  { %1401 = vmatpush1.msra.mxu0 %v3237_v38  ;;  %1470 = vmatpush1.msra.mxu1 %v3365_v12 }
 0x39b   :  { %1402 = vmatprep.subr.mxu0 %v3240_v40  ;;  %1471 = vmatprep.subr.mxu1 %v3368_v16 }
 0x39c   :  { %1403 = vmatpush1.msra.mxu0 %v3243_v42  ;;  %1472 = vmatpush1.msra.mxu1 %v3371_v20  ;;  %v1043_v20 = vld [vmem:[#allocation4 + $0x3] ss:$8 sm:$0xf] }
 0x39d   :  { %1635 = vmatprep.subr.mxu0 %v3152_v11  ;;  %v3374_v11 = vld [vmem:[#allocation11 + $0x18] sm:$0xff] }
 0x39e   :  { %3734 = vst [vmem:[#allocation35_spill] sm:$0xff] %v3374_v11  ;;  %1473 = vmatprep.subr.mxu1 %v3374_v11 }
 0x39f   :  { %1474 = vmatpush1.msra.mxu1 %v3377_v46 }
 0x3a0   :  { %1706 = vmatprep.subr.mxu1 %v3286_v24 }
 0x43d   :  { %v1175_v42 = vpop.f32.mrf.mxu0  ;;  %v1246_v40 = vpop.f32.mrf.mxu1 }
 0x43f   :  { %v1177_v38 = vpop.f32.mrf.mxu0  ;;  %v1248_v36 = vpop.f32.mrf.mxu1 }
 0x440   :  { %v1255_v34 = vcombine.low %v1175_v42, %v1177_v38  ;;  %v1256_v12 = vcombine.low %v1246_v40, %v1248_v36  ;;  %v1291_v36 = vld [vmem:[#allocation3] sm:$0x1] }
 0x442   :  { %v1263_v9 = vrot.slane %v1255_v34, %v3046_v51  ;;  %v1270_v16 = vrot.slane %v1256_v12, %v3046_v51 }
 0x444   :  { %v1271_v30 = vcombine.low %v1263_v9, %v1270_v16  ;;  %v3743_v16 = vld [vmem:[#allocation26_spill] sm:$0xff] }
 0x446   :  { %v1278_v3 = vrot.slane %v1271_v30, %v3046_v51 }
 0x448   :  { %v1280_v26 = vadd.f32 %v1278_v3, %v1043_v20  ;;  %v3742_v3 = vld [vmem:[#allocation31_spill] sm:$0xff]  ;;  %v3744_v20 = vld [vmem:[#allocation36_spill] sm:$0xff] }
 0x44a   :  { %v2474_v11 = vmul.f32 -1.442695, %v1280_v26  ;;  %v1288_v24 = vrot.slane %v1280_v26, 3  ;;  %v3738_v26 = vld [vmem:[#allocation29_spill] sm:$0xff] }
 0x44c   :  { %2568 = vpow2.f32 %v2474_v11 }
 0x459   :  { %v2569_v46 = vpop.eup %2568 }
 0x45a   :  { %v1284_v61 = vadd.f32 1.0, %v2569_v46  ;;  %v3736_v46 = vld [vmem:[#allocation32_spill] sm:$0xff] }
 0x45c   :  { %2570 = vrcp.f32 %v1284_v61  ;;  %v3741_v61 = vld [vmem:[#allocation21_spill] sm:$0xff] }
 0x45d   :  { %2572 = vtanh.f32 %v1288_v24  ;;  %v3739_v24 = vld [vmem:[#allocation24_spill] sm:$0xff] }
 0x469   :  { %v2571_v22 = vpop.eup %2570 }
 0x46a   :  { %v1293_v0 = vrot.slane %v2571_v22, 1  ;;  %v2573_v38 = vpop.eup %2572  ;;  %v1299_v9 = vrot.slane %v2571_v22, 2 }
 0x46b   :  { %v1296_v34 = vmul.f32 %v2573_v38, %v2571_v22  ;;  %v3737_v22 = vld [vmem:[#allocation20_spill] sm:$0xff]  ;;  %v3745_v38 = vld [vmem:[#allocation23_spill] sm:$0xff] }
 0x46c   :  { %v1295_v40 = vmul.f32 %v1293_v0, %v1291_v36  ;;  %v3740_v0 = vld [vmem:[#allocation34_spill] sm:$0xff]  ;;  %v3746_v36 = vld [vmem:[#allocation33_spill] sm:$0xff] }
 0x46e   :  { %v1297_v42 = vadd.f32 %v1296_v34, %v1295_v40  ;;  %v3747_v40 = vld [vmem:[#allocation28_spill] sm:$0xff]  ;;  %v3748_v34 = vld [vmem:[#allocation38_spill] sm:$0xff] }
 0x470   :  { %2574 = vtanh.f32 %v1297_v42  ;;  %1302 = vst [vmem:[#allocation3] sm:$0x1] %v1297_v42  ;;  %v3749_v42 = vld [vmem:[#allocation25_spill] sm:$0xff] }
 0x47d   :  { %v2575_v30 = vpop.eup %2574 }
 0x47e   :  { %v1301_v12 = vmul.f32 %v2575_v30, %v1299_v9  ;;  %v3750_v9 = vld [vmem:[#allocation35_spill] sm:$0xff]  ;;  %v3751_v30 = vld [vmem:[#allocation30_spill] sm:$0xff] }
 0x480   :  { %1303 = vst [vmem:[#allocation2] sm:$0x1] %v1301_v12  ;;  %1304 = vst [vmem:[#allocation5 + $0x3] sm:$0x1] %v1301_v12  ;;  %v3752_v12 = vmov 0.0  }
 0x487   :  { %v1307_v11 = vld [vmem:[#allocation2] sm:$0x1] }
 0x488   :  { %1437 = vmatmul.mubr.f32.vlgmr.msra.gmra.mxu0 %v1307_v11  ;;  %1508 = vmatmul.mubr.f32.vlgmr.msra.gmra.mxu1 %v1307_v11  ;;  %v3753_v11 = vld [vmem:[#allocation39_spill] sm:$0xff] }
 0x489   :  { %1636 = vmatpush1.msra.mxu0 %v3155_v13  ;;  %1707 = vmatpush1.msra.mxu1 %v3289_v28 }
 0x48a   :  { %1637 = vmatprep.subr.mxu0 %v3158_v15  ;;  %1708 = vmatprep.subr.mxu1 %v3292_v32 }
 0x48b   :  { %1638 = vmatpush1.msra.mxu0 %v3161_v17  ;;  %1709 = vmatpush1.msra.mxu1 %v3295_v44 }
 0x48c   :  { %1639 = vmatprep.subr.mxu0 %v3164_v19  ;;  %1710 = vmatprep.subr.mxu1 %v3298_v60 }
 0x48d   :  { %1640 = vmatpush1.msra.mxu0 %v3167_v21  ;;  %1711 = vmatpush1.msra.mxu1 %v3301_v58 }
 0x48e   :  { %1641 = vmatprep.subr.mxu0 %v3170_v23  ;;  %1712 = vmatprep.subr.mxu1 %v3304_v62 }
 0x48f   :  { %1642 = vmatpush1.msra.mxu0 %v3173_v25  ;;  %1713 = vmatpush1.msra.mxu1 %v3307_v8 }
 0x490   :  { %1643 = vmatprep.subr.mxu0 %v3176_v27  ;;  %1714 = vmatprep.subr.mxu1 %v3310_v56 }
 0x491   :  { %1644 = vmatpush1.msra.mxu0 %v3179_v29  ;;  %1715 = vmatpush1.msra.mxu1 %v3313_v54 }
 0x492   :  { %1645 = vmatprep.subr.mxu0 %v3182_v31  ;;  %1716 = vmatprep.subr.mxu1 %v3316_v57 }
 0x493   :  { %1646 = vmatpush1.msra.mxu0 %v3185_v33  ;;  %1717 = vmatpush1.msra.mxu1 %v3319_v59 }
 0x494   :  { %1647 = vmatprep.subr.mxu0 %v3188_v35  ;;  %1718 = vmatprep.subr.mxu1 %v3322_v50 }
 0x495   :  { %1648 = vmatpush1.msra.mxu0 %v3191_v37  ;;  %1719 = vmatpush1.msra.mxu1 %v3325_v52 }
 0x496   :  { %1649 = vmatprep.subr.mxu0 %v3194_v39  ;;  %1720 = vmatprep.subr.mxu1 %v3328_v63 }
 0x497   :  { %1650 = vmatpush1.msra.mxu0 %v3197_v41  ;;  %1721 = vmatpush1.msra.mxu1 %v3331_v55 }
 0x498   :  { %1651 = vmatprep.subr.mxu0 %v3200_v43  ;;  %1722 = vmatprep.subr.mxu1 %v3334_v53 }
 0x499   :  { %1652 = vmatpush1.msra.mxu0 %v3203_v45  ;;  %1723 = vmatpush1.msra.mxu1 %v3337_v1 }
 0x49a   :  { %1653 = vmatprep.subr.mxu0 %v3206_v47  ;;  %1724 = vmatprep.subr.mxu1 %v3340_v48 }
 0x49b   :  { %1654 = vmatpush1.msra.mxu0 %v3209_v49  ;;  %1725 = vmatpush1.msra.mxu1 %v3343_v4 }
 0x49c   :  { %1655 = vmatprep.subr.mxu0 %v3212_v7  ;;  %1726 = vmatprep.subr.mxu1 %v3346_v6 }
 0x49d   :  { %1656 = vmatpush1.msra.mxu0 %v3215_v10  ;;  %1727 = vmatpush1.msra.mxu1 %v3349_v2 }
 0x49e   :  { %1657 = vmatprep.subr.mxu0 %v3218_v14  ;;  %1728 = vmatprep.subr.mxu1 %v3352_v5 }
 0x49f   :  { %1658 = vmatpush1.msra.mxu0 %v3221_v18  ;;  %1729 = vmatpush1.msra.mxu1 %v3736_v46 }
 0x4a0   :  { %1659 = vmatprep.subr.mxu0 %v3737_v22  ;;  %1730 = vmatprep.subr.mxu1 %v3738_v26 }
 0x4a1   :  { %1660 = vmatpush1.msra.mxu0 %v3739_v24  ;;  %1731 = vmatpush1.msra.mxu1 %v3740_v0 }
 0x4a2   :  { %1661 = vmatprep.subr.mxu0 %v3741_v61  ;;  %1732 = vmatprep.subr.mxu1 %v3742_v3 }
 0x4a3   :  { %1662 = vmatpush1.msra.mxu0 %v3743_v16  ;;  %1733 = vmatpush1.msra.mxu1 %v3744_v20  ;;  %v3754_v20 = vld [vmem:[#allocation22_spill] sm:$0xff] }
 0x4a4   :  { %1663 = vmatprep.subr.mxu0 %v3745_v38  ;;  %1734 = vmatprep.subr.mxu1 %v3746_v36  ;;  %v3755_v38 = vld [vmem:[#allocation27_spill] sm:$0xff] }
 0x4a5   :  { %1664 = vmatpush1.msra.mxu0 %v3747_v40  ;;  %1735 = vmatpush1.msra.mxu1 %v3748_v34 }
 0x4a6   :  { %1665 = vmatprep.subr.mxu0 %v3749_v42  ;;  %1736 = vmatprep.subr.mxu1 %v3750_v9 }
 0x4a7   :  { %1666 = vmatpush1.msra.mxu0 %v3751_v30  ;;  %1699 = vmatprep.mubr.f32.mxu0 %v3752_v12 }
 0x4a8   :  { %1737 = vmatpush1.msra.mxu1 %v3753_v11  ;;  %1770 = vmatprep.mubr.f32.mxu1 %v3752_v12  ;;  %v1306_v11 = vld [vmem:[#allocation4 + $0x4] ss:$8 sm:$0xf] }
 0x4a9   :  { %1898 = vmatprep.subr.mxu0 %v3754_v20  ;;  %1969 = vmatprep.subr.mxu1 %v3755_v38 }
 0x548   :  { %v1438_v36 = vpop.f32.mrf.mxu0  ;;  %v1509_v40 = vpop.f32.mrf.mxu1 }
 0x54a   :  { %v1440_v16 = vpop.f32.mrf.mxu0  ;;  %v1511_v34 = vpop.f32.mrf.mxu1 }
 0x54b   :  { %v1518_v3 = vcombine.low %v1438_v36, %v1440_v16  ;;  %v1519_v42 = vcombine.low %v1509_v40, %v1511_v34  ;;  %v1554_v36 = vld [vmem:[#allocation3] sm:$0x1] }
 0x54d   :  { %v1526_v9 = vrot.slane %v1518_v3, %v3046_v51  ;;  %v1533_v30 = vrot.slane %v1519_v42, %v3046_v51 }
 0x54f   :  { %v1534_v61 = vcombine.low %v1526_v9, %v1533_v30 }
 0x551   :  { %v1541_v0 = vrot.slane %v1534_v61, %v3046_v51 }
 0x553   :  { %v1543_v24 = vadd.f32 %v1541_v0, %v1306_v11 }
 0x555   :  { %v2475_v12 = vmul.f32 -1.442695, %v1543_v24  ;;  %v1551_v38 = vrot.slane %v1543_v24, 3 }
 0x557   :  { %2576 = vpow2.f32 %v2475_v12  ;;  %v1569_v12 = vld [vmem:[#allocation4 + $0x5] ss:$8 sm:$0xf] }
 0x564   :  { %v2577_v20 = vpop.eup %2576 }
 0x565   :  { %v1547_v26 = vadd.f32 1.0, %v2577_v20 }
 0x567   :  { %2578 = vrcp.f32 %v1547_v26 }
 0x568   :  { %2580 = vtanh.f32 %v1551_v38 }
 0x574   :  { %v2579_v22 = vpop.eup %2578 }
 0x575   :  { %v1556_v46 = vrot.slane %v2579_v22, 1  ;;  %v2581_v16 = vpop.eup %2580  ;;  %v1562_v42 = vrot.slane %v2579_v22, 2 }
 0x576   :  { %v1559_v3 = vmul.f32 %v2581_v16, %v2579_v22 }
 0x577   :  { %v1558_v40 = vmul.f32 %v1556_v46, %v1554_v36 }
 0x579   :  { %v1560_v34 = vadd.f32 %v1559_v3, %v1558_v40 }
 0x57b   :  { %2582 = vtanh.f32 %v1560_v34  ;;  %1565 = vst [vmem:[#allocation3] sm:$0x1] %v1560_v34 }
 0x588   :  { %v2583_v61 = vpop.eup %2582 }
 0x589   :  { %v1564_v9 = vmul.f32 %v2583_v61, %v1562_v42  ;;  %v1817_v61 = vld [vmem:[#allocation3] sm:$0x1] }
 0x58b   :  { %1566 = vst [vmem:[#allocation2] sm:$0x1] %v1564_v9  ;;  %1567 = vst [vmem:[#allocation5 + $0x4] sm:$0x1] %v1564_v9 }
 0x592   :  { %v1570_v0 = vld [vmem:[#allocation2] sm:$0x1] }
 0x593   :  { %1700 = vmatmul.mubr.f32.vlgmr.msra.gmra.mxu0 %v1570_v0  ;;  %1771 = vmatmul.mubr.f32.vlgmr.msra.gmra.mxu1 %v1570_v0 }
 0x594   :  { %1899 = vmatpush1.msra.mxu0 %v3155_v13  ;;  %1970 = vmatpush1.msra.mxu1 %v3289_v28  ;;  %v3756_v13 = vld [vmem:[#allocation32_spill] sm:$0xff] }
 0x595   :  { %1900 = vmatprep.subr.mxu0 %v3158_v15  ;;  %1971 = vmatprep.subr.mxu1 %v3292_v32  ;;  %v3757_v15 = vld [vmem:[#allocation20_spill] sm:$0xff] }
 0x596   :  { %1901 = vmatpush1.msra.mxu0 %v3161_v17  ;;  %1972 = vmatpush1.msra.mxu1 %v3295_v44  ;;  %v3758_v17 = vld [vmem:[#allocation29_spill] sm:$0xff] }
 0x597   :  { %1902 = vmatprep.subr.mxu0 %v3164_v19  ;;  %1973 = vmatprep.subr.mxu1 %v3298_v60  ;;  %v3759_v19 = vld [vmem:[#allocation24_spill] sm:$0xff] }
 0x598   :  { %1903 = vmatpush1.msra.mxu0 %v3167_v21  ;;  %1974 = vmatpush1.msra.mxu1 %v3301_v58  ;;  %v3760_v21 = vld [vmem:[#allocation34_spill] sm:$0xff] }
 0x599   :  { %1904 = vmatprep.subr.mxu0 %v3170_v23  ;;  %1975 = vmatprep.subr.mxu1 %v3304_v62  ;;  %v3761_v23 = vld [vmem:[#allocation21_spill] sm:$0xff] }
 0x59a   :  { %1905 = vmatpush1.msra.mxu0 %v3173_v25  ;;  %1976 = vmatpush1.msra.mxu1 %v3307_v8  ;;  %v3762_v25 = vld [vmem:[#allocation31_spill] sm:$0xff] }
 0x59b   :  { %1906 = vmatprep.subr.mxu0 %v3176_v27  ;;  %1977 = vmatprep.subr.mxu1 %v3310_v56  ;;  %v3763_v27 = vld [vmem:[#allocation26_spill] sm:$0xff] }
 0x59c   :  { %1907 = vmatpush1.msra.mxu0 %v3179_v29  ;;  %1978 = vmatpush1.msra.mxu1 %v3313_v54  ;;  %v3764_v29 = vld [vmem:[#allocation36_spill] sm:$0xff] }
 0x59d   :  { %1908 = vmatprep.subr.mxu0 %v3182_v31  ;;  %1979 = vmatprep.subr.mxu1 %v3316_v57  ;;  %v3765_v31 = vld [vmem:[#allocation23_spill] sm:$0xff] }
 0x59e   :  { %1909 = vmatpush1.msra.mxu0 %v3185_v33  ;;  %1980 = vmatpush1.msra.mxu1 %v3319_v59  ;;  %v3766_v33 = vld [vmem:[#allocation33_spill] sm:$0xff] }
 0x59f   :  { %1910 = vmatprep.subr.mxu0 %v3188_v35  ;;  %1981 = vmatprep.subr.mxu1 %v3322_v50  ;;  %v3767_v35 = vld [vmem:[#allocation28_spill] sm:$0xff] }
 0x5a0   :  { %1911 = vmatpush1.msra.mxu0 %v3191_v37  ;;  %1982 = vmatpush1.msra.mxu1 %v3325_v52  ;;  %v3768_v37 = vld [vmem:[#allocation38_spill] sm:$0xff] }
 0x5a1   :  { %1912 = vmatprep.subr.mxu0 %v3194_v39  ;;  %1983 = vmatprep.subr.mxu1 %v3328_v63  ;;  %v3769_v39 = vld [vmem:[#allocation25_spill] sm:$0xff] }
 0x5a2   :  { %1913 = vmatpush1.msra.mxu0 %v3197_v41  ;;  %1984 = vmatpush1.msra.mxu1 %v3331_v55  ;;  %v3770_v41 = vld [vmem:[#allocation35_spill] sm:$0xff] }
 0x5a3   :  { %1914 = vmatprep.subr.mxu0 %v3200_v43  ;;  %1985 = vmatprep.subr.mxu1 %v3334_v53  ;;  %v3771_v43 = vld [vmem:[#allocation30_spill] sm:$0xff] }
 0x5a4   :  { %1915 = vmatpush1.msra.mxu0 %v3203_v45  ;;  %1986 = vmatpush1.msra.mxu1 %v3337_v1  ;;  %v3772_v45 = vmov 0.0  }
 0x5a5   :  { %1916 = vmatprep.subr.mxu0 %v3206_v47  ;;  %1987 = vmatprep.subr.mxu1 %v3340_v48  ;;  %v3773_v47 = vld [vmem:[#allocation39_spill] sm:$0xff] }
 0x5a6   :  { %1917 = vmatpush1.msra.mxu0 %v3209_v49  ;;  %1988 = vmatpush1.msra.mxu1 %v3343_v4  ;;  %v3774_v49 = vld [vmem:[#allocation27_spill] sm:$0xff] }
 0x5a7   :  { %1918 = vmatprep.subr.mxu0 %v3212_v7  ;;  %1989 = vmatprep.subr.mxu1 %v3346_v6 }
 0x5a8   :  { %1919 = vmatpush1.msra.mxu0 %v3215_v10  ;;  %1990 = vmatpush1.msra.mxu1 %v3349_v2 }
 0x5a9   :  { %1920 = vmatprep.subr.mxu0 %v3218_v14  ;;  %1991 = vmatprep.subr.mxu1 %v3352_v5 }
 0x5aa   :  { %1921 = vmatpush1.msra.mxu0 %v3221_v18  ;;  %1992 = vmatpush1.msra.mxu1 %v3756_v13 }
 0x5ab   :  { %1922 = vmatprep.subr.mxu0 %v3757_v15  ;;  %1993 = vmatprep.subr.mxu1 %v3758_v17 }
 0x5ac   :  { %1923 = vmatpush1.msra.mxu0 %v3759_v19  ;;  %1994 = vmatpush1.msra.mxu1 %v3760_v21 }
 0x5ad   :  { %1924 = vmatprep.subr.mxu0 %v3761_v23  ;;  %1995 = vmatprep.subr.mxu1 %v3762_v25 }
 0x5ae   :  { %1925 = vmatpush1.msra.mxu0 %v3763_v27  ;;  %1996 = vmatpush1.msra.mxu1 %v3764_v29 }
 0x5af   :  { %1926 = vmatprep.subr.mxu0 %v3765_v31  ;;  %1997 = vmatprep.subr.mxu1 %v3766_v33 }
 0x5b0   :  { %1927 = vmatpush1.msra.mxu0 %v3767_v35  ;;  %1998 = vmatpush1.msra.mxu1 %v3768_v37  ;;  %v2102_v35 = vld [vmem:[#allocation11 + $0x28] sm:$0xff] }
 0x5b1   :  { %1928 = vmatprep.subr.mxu0 %v3769_v39  ;;  %1999 = vmatprep.subr.mxu1 %v3770_v41  ;;  %v2098_v39 = vld [vmem:[#allocation11 + $0x8] sm:$0xff] }
 0x5b2   :  { %1929 = vmatpush1.msra.mxu0 %v3771_v43  ;;  %1962 = vmatprep.mubr.f32.mxu0 %v3772_v45 }
 0x5b3   :  { %2000 = vmatpush1.msra.mxu1 %v3773_v47  ;;  %2033 = vmatprep.mubr.f32.mxu1 %v3772_v45 }
 0x5b4   :  { %2232 = vmatprep.subr.mxu1 %v3774_v49 }
 0x653   :  { %v1701_v7 = vpop.f32.mrf.mxu0  ;;  %v1772_v10 = vpop.f32.mrf.mxu1 }
 0x655   :  { %v1703_v14 = vpop.f32.mrf.mxu0  ;;  %v1774_v18 = vpop.f32.mrf.mxu1 }
 0x656   :  { %v1781_v46 = vcombine.low %v1701_v7, %v1703_v14  ;;  %v1782_v22 = vcombine.low %v1772_v10, %v1774_v18 }
 0x658   :  { %v1789_v26 = vrot.slane %v1781_v46, %v3046_v51  ;;  %v1796_v24 = vrot.slane %v1782_v22, %v3046_v51 }
 0x65a   :  { %v1797_v38 = vcombine.low %v1789_v26, %v1796_v24  ;;  %v1832_v24 = vld [vmem:[#allocation4 + $0x6] ss:$8 sm:$0xf] }
 0x65c   :  { %v1804_v30 = vrot.slane %v1797_v38, %v3046_v51 }
 0x65e   :  { %v1806_v11 = vadd.f32 %v1804_v30, %v1569_v12 }
 0x660   :  { %v2476_v20 = vmul.f32 -1.442695, %v1806_v11  ;;  %v1814_v40 = vrot.slane %v1806_v11, 3 }
 0x662   :  { %2584 = vpow2.f32 %v2476_v20 }
 0x66f   :  { %v2585_v16 = vpop.eup %2584 }
 0x670   :  { %v1810_v36 = vadd.f32 1.0, %v2585_v16 }
 0x672   :  { %2586 = vrcp.f32 %v1810_v36 }
 0x673   :  { %2588 = vtanh.f32 %v1814_v40 }
 0x67f   :  { %v2587_v3 = vpop.eup %2586 }
 0x680   :  { %v1819_v34 = vrot.slane %v2587_v3, 1  ;;  %v2589_v42 = vpop.eup %2588  ;;  %v1825_v19 = vrot.slane %v2587_v3, 2 }
 0x681   :  { %v1822_v0 = vmul.f32 %v2589_v42, %v2587_v3 }
 0x682   :  { %v1821_v9 = vmul.f32 %v1819_v34, %v1817_v61 }
 0x684   :  { %v1823_v15 = vadd.f32 %v1822_v0, %v1821_v9 }
 0x686   :  { %2590 = vtanh.f32 %v1823_v15  ;;  %1828 = vst [vmem:[#allocation3] sm:$0x1] %v1823_v15 }
 0x68d   :  { %v2080_v3 = vld [vmem:[#allocation3] sm:$0x1] }
 0x693   :  { %v2591_v23 = vpop.eup %2590 }
 0x694   :  { %v1827_v27 = vmul.f32 %v2591_v23, %v1825_v19  ;;  %v2373_v23 = vld [vmem:[#allocation12 + $0x78] sm:$0xff] }
 0x696   :  { %1829 = vst [vmem:[#allocation2] sm:$0x1] %v1827_v27  ;;  %1830 = vst [vmem:[#allocation5 + $0x5] sm:$0x1] %v1827_v27  ;;  %v2372_v27 = vld [vmem:[#allocation12 + $0x70] sm:$0xff] }
 0x69d   :  { %v1833_v31 = vld [vmem:[#allocation2] sm:$0x1] }
 0x69e   :  { %1963 = vmatmul.mubr.f32.vlgmr.msra.gmra.mxu0 %v1833_v31  ;;  %2034 = vmatmul.mubr.f32.vlgmr.msra.gmra.mxu1 %v1833_v31  ;;  %v2371_v31 = vld [vmem:[#allocation12 + $0x68] sm:$0xff] }
 0x69f   :  { %2233 = vmatpush1.msra.mxu1 %v3289_v28  ;;  %2225 = vmatprep.mubr.f32.mxu0 %v3772_v45  ;;  %v2158_v28 = vld [vmem:[#allocation11 + $0x1e8] sm:$0xff] }
 0x6a0   :  { %2234 = vmatprep.subr.mxu1 %v3292_v32  ;;  %2296 = vmatprep.mubr.f32.mxu1 %v3772_v45  ;;  %v2157_v32 = vld [vmem:[#allocation11 + $0x1e0] sm:$0xff] }
 0x6a1   :  { %2235 = vmatpush1.msra.mxu1 %v3295_v44  ;;  %2161 = vmatprep.subr.mxu0 %v2158_v28  ;;  %v2154_v44 = vld [vmem:[#allocation11 + $0x1c8] sm:$0xff]  ;;  %v2370_v28 = vld [vmem:[#allocation12 + $0x60] sm:$0xff] }
 0x6a2   :  { %2236 = vmatprep.subr.mxu1 %v3298_v60  ;;  %2162 = vmatpush1.msra.mxu0 %v2157_v32  ;;  %v2153_v60 = vld [vmem:[#allocation11 + $0x1c0] sm:$0xff]  ;;  %v2369_v32 = vld [vmem:[#allocation12 + $0x58] sm:$0xff] }
 0x6a3   :  { %2237 = vmatpush1.msra.mxu1 %v3301_v58  ;;  %2163 = vmatprep.subr.mxu0 %v2154_v44  ;;  %v2150_v58 = vld [vmem:[#allocation11 + $0x1a8] sm:$0xff]  ;;  %v2368_v44 = vld [vmem:[#allocation12 + $0x50] sm:$0xff] }
 0x6a4   :  { %2238 = vmatprep.subr.mxu1 %v3304_v62  ;;  %2164 = vmatpush1.msra.mxu0 %v2153_v60  ;;  %v2149_v62 = vld [vmem:[#allocation11 + $0x1a0] sm:$0xff]  ;;  %v2367_v60 = vld [vmem:[#allocation12 + $0x48] sm:$0xff] }
 0x6a5   :  { %2239 = vmatpush1.msra.mxu1 %v3307_v8  ;;  %2165 = vmatprep.subr.mxu0 %v2150_v58  ;;  %v2146_v8 = vld [vmem:[#allocation11 + $0x188] sm:$0xff]  ;;  %v2366_v58 = vld [vmem:[#allocation12 + $0x40] sm:$0xff] }
 0x6a6   :  { %2240 = vmatprep.subr.mxu1 %v3310_v56  ;;  %2166 = vmatpush1.msra.mxu0 %v2149_v62  ;;  %v2145_v56 = vld [vmem:[#allocation11 + $0x180] sm:$0xff]  ;;  %v2365_v62 = vld [vmem:[#allocation12 + $0x38] sm:$0xff] }
 0x6a7   :  { %2241 = vmatpush1.msra.mxu1 %v3313_v54  ;;  %2167 = vmatprep.subr.mxu0 %v2146_v8  ;;  %v2142_v54 = vld [vmem:[#allocation11 + $0x168] sm:$0xff]  ;;  %v2364_v8 = vld [vmem:[#allocation12 + $0x30] sm:$0xff] }
 0x6a8   :  { %2242 = vmatprep.subr.mxu1 %v3316_v57  ;;  %2168 = vmatpush1.msra.mxu0 %v2145_v56  ;;  %v2141_v57 = vld [vmem:[#allocation11 + $0x160] sm:$0xff]  ;;  %v2363_v56 = vld [vmem:[#allocation12 + $0x28] sm:$0xff] }
 0x6a9   :  { %2243 = vmatpush1.msra.mxu1 %v3319_v59  ;;  %2169 = vmatprep.subr.mxu0 %v2142_v54  ;;  %v2138_v59 = vld [vmem:[#allocation11 + $0x148] sm:$0xff]  ;;  %v2362_v54 = vld [vmem:[#allocation12 + $0x20] sm:$0xff] }
 0x6aa   :  { %2244 = vmatprep.subr.mxu1 %v3322_v50  ;;  %2170 = vmatpush1.msra.mxu0 %v2141_v57  ;;  %v2137_v50 = vld [vmem:[#allocation11 + $0x140] sm:$0xff]  ;;  %v2361_v57 = vld [vmem:[#allocation12 + $0x18] sm:$0xff] }
 0x6ab   :  { %2245 = vmatpush1.msra.mxu1 %v3325_v52  ;;  %2171 = vmatprep.subr.mxu0 %v2138_v59  ;;  %v2134_v52 = vld [vmem:[#allocation11 + $0x128] sm:$0xff]  ;;  %v2360_v59 = vld [vmem:[#allocation12 + $0x10] sm:$0xff] }
 0x6ac   :  { %2246 = vmatprep.subr.mxu1 %v3328_v63  ;;  %2172 = vmatpush1.msra.mxu0 %v2137_v50  ;;  %v2133_v63 = vld [vmem:[#allocation11 + $0x120] sm:$0xff]  ;;  %v2359_v50 = vld [vmem:[#allocation12 + $0x8] sm:$0xff] }
 0x6ad   :  { %2247 = vmatpush1.msra.mxu1 %v3331_v55  ;;  %2173 = vmatprep.subr.mxu0 %v2134_v52  ;;  %v2130_v55 = vld [vmem:[#allocation11 + $0x108] sm:$0xff]  ;;  %v2358_v52 = vld [vmem:[#allocation12] sm:$0xff] }
 0x6ae   :  { %2248 = vmatprep.subr.mxu1 %v3334_v53  ;;  %2174 = vmatpush1.msra.mxu0 %v2133_v63  ;;  %v2129_v53 = vld [vmem:[#allocation11 + $0x100] sm:$0xff] }
 0x6af   :  { %2249 = vmatpush1.msra.mxu1 %v3337_v1  ;;  %2175 = vmatprep.subr.mxu0 %v2130_v55  ;;  %v2126_v1 = vld [vmem:[#allocation11 + $0xe8] sm:$0xff] }
 0x6b0   :  { %2250 = vmatprep.subr.mxu1 %v3340_v48  ;;  %2176 = vmatpush1.msra.mxu0 %v2129_v53  ;;  %v2125_v48 = vld [vmem:[#allocation11 + $0xe0] sm:$0xff] }
 0x6b1   :  { %2251 = vmatpush1.msra.mxu1 %v3343_v4  ;;  %2177 = vmatprep.subr.mxu0 %v2126_v1  ;;  %v2122_v4 = vld [vmem:[#allocation11 + $0xc8] sm:$0xff] }
 0x6b2   :  { %2252 = vmatprep.subr.mxu1 %v3346_v6  ;;  %2178 = vmatpush1.msra.mxu0 %v2125_v48  ;;  %v2121_v6 = vld [vmem:[#allocation11 + $0xc0] sm:$0xff] }
 0x6b3   :  { %2253 = vmatpush1.msra.mxu1 %v3349_v2  ;;  %2179 = vmatprep.subr.mxu0 %v2122_v4  ;;  %v2118_v2 = vld [vmem:[#allocation11 + $0xa8] sm:$0xff] }
 0x6b4   :  { %2254 = vmatprep.subr.mxu1 %v3352_v5  ;;  %2180 = vmatpush1.msra.mxu0 %v2121_v6  ;;  %v2117_v5 = vld [vmem:[#allocation11 + $0xa0] sm:$0xff] }
 0x6b5   :  { %2255 = vmatpush1.msra.mxu1 %v3756_v13  ;;  %2181 = vmatprep.subr.mxu0 %v2118_v2  ;;  %v2114_v13 = vld [vmem:[#allocation11 + $0x88] sm:$0xff] }
 0x6b6   :  { %2256 = vmatprep.subr.mxu1 %v3758_v17  ;;  %2182 = vmatpush1.msra.mxu0 %v2117_v5  ;;  %v2113_v17 = vld [vmem:[#allocation11 + $0x80] sm:$0xff] }
 0x6b7   :  { %2257 = vmatpush1.msra.mxu1 %v3760_v21  ;;  %2183 = vmatprep.subr.mxu0 %v2114_v13  ;;  %v2110_v21 = vld [vmem:[#allocation11 + $0x68] sm:$0xff] }
 0x6b8   :  { %2258 = vmatprep.subr.mxu1 %v3762_v25  ;;  %v2109_v25 = vld [vmem:[#allocation11 + $0x60] sm:$0xff]  ;;  %2184 = vmatpush1.msra.mxu0 %v2113_v17 }
 0x6b9   :  { %2259 = vmatpush1.msra.mxu1 %v3764_v29  ;;  %v2106_v29 = vld [vmem:[#allocation11 + $0x48] sm:$0xff]  ;;  %2185 = vmatprep.subr.mxu0 %v2110_v21 }
 0x6ba   :  { %2260 = vmatprep.subr.mxu1 %v3766_v33  ;;  %v2105_v33 = vld [vmem:[#allocation11 + $0x40] sm:$0xff]  ;;  %2186 = vmatpush1.msra.mxu0 %v2109_v25 }
 0x6bb   :  { %2261 = vmatpush1.msra.mxu1 %v3768_v37  ;;  %2187 = vmatprep.subr.mxu0 %v2106_v29  ;;  %v2101_v37 = vld [vmem:[#allocation11 + $0x20] sm:$0xff] }
 0x6bc   :  { %2262 = vmatprep.subr.mxu1 %v3770_v41  ;;  %2188 = vmatpush1.msra.mxu0 %v2105_v33  ;;  %v2097_v41 = vld [vmem:[#allocation11] sm:$0xff] }
 0x6bd   :  { %2263 = vmatpush1.msra.mxu1 %v3773_v47  ;;  %2189 = vmatprep.subr.mxu0 %v2102_v35  ;;  %v2095_v17 = vld [vmem:[#allocation4 + $0x7] ss:$8 sm:$0xf] }
 0x6be   :  { %2190 = vmatpush1.msra.mxu0 %v2101_v37 }
 0x6bf   :  { %2191 = vmatprep.subr.mxu0 %v2098_v39 }
 0x6c0   :  { %2192 = vmatpush1.msra.mxu0 %v2097_v41 }
 0x6c1   :  { %2497 = vmatprep.subr.mxu0 %v3772_v45 }
 0x75e   :  { %v1964_v43 = vpop.f32.mrf.mxu0  ;;  %v2035_v47 = vpop.f32.mrf.mxu1 }
 0x760   :  { %v1966_v49 = vpop.f32.mrf.mxu0  ;;  %v2037_v7 = vpop.f32.mrf.mxu1 }
 0x761   :  { %v2044_v10 = vcombine.low %v1964_v43, %v1966_v49  ;;  %v2045_v14 = vcombine.low %v2035_v47, %v2037_v7 }
 0x763   :  { %v2052_v18 = vrot.slane %v2044_v10, %v3046_v51  ;;  %v2059_v46 = vrot.slane %v2045_v14, %v3046_v51 }
 0x765   :  { %v2060_v22 = vcombine.low %v2052_v18, %v2059_v46  ;;  %v2479_v18 = vld [vmem:[%s3590_s5] ss:$0 sm:$0xff] }
 0x767   :  { %v2067_v26 = vrot.slane %v2060_v22, %v3046_v51 }
 0x769   :  { %v2069_v38 = vadd.f32 %v2067_v26, %v1832_v24 }
 0x76b   :  { %v2477_v30 = vmul.f32 -1.442695, %v2069_v38  ;;  %v2077_v20 = vrot.slane %v2069_v38, 3 }
 0x76d   :  { %2592 = vpow2.f32 %v2477_v30 }
 0x77a   :  { %v2593_v12 = vpop.eup %2592 }
 0x77b   :  { %v2073_v11 = vadd.f32 1.0, %v2593_v12 }
 0x77d   :  { %2594 = vrcp.f32 %v2073_v11 }
 0x77e   :  { %2596 = vtanh.f32 %v2077_v20 }
 0x78a   :  { %v2595_v16 = vpop.eup %2594 }
 0x78b   :  { %v2082_v36 = vrot.slane %v2595_v16, 1  ;;  %v2597_v40 = vpop.eup %2596  ;;  %v2088_v9 = vrot.slane %v2595_v16, 2 }
 0x78c   :  { %v2085_v42 = vmul.f32 %v2597_v40, %v2595_v16 }
 0x78d   :  { %v2084_v34 = vmul.f32 %v2082_v36, %v2080_v3 }
 0x78f   :  { %v2086_v61 = vadd.f32 %v2085_v42, %v2084_v34 }
 0x791   :  { %2598 = vtanh.f32 %v2086_v61  ;;  %2091 = vst [vmem:[#allocation3] sm:$0x1] %v2086_v61 }
 0x798   :  { %v2343_v41 = vld [vmem:[#allocation3] sm:$0x1] }
 0x79e   :  { %v2599_v0 = vpop.eup %2598 }
 0x79f   :  { %v2090_v15 = vmul.f32 %v2599_v0, %v2088_v9 }
 0x7a1   :  { %2092 = vst [vmem:[#allocation2] sm:$0x1] %v2090_v15  ;;  %2093 = vst [vmem:[#allocation5 + $0x6] sm:$0x1] %v2090_v15 }
 0x7a8   :  { %v2096_v19 = vld [vmem:[#allocation2] sm:$0x1] }
 0x7a9   :  { %2226 = vmatmul.mubr.f32.vlgmr.msra.gmra.mxu0 %v2096_v19  ;;  %2297 = vmatmul.mubr.f32.vlgmr.msra.gmra.mxu1 %v2096_v19 }
 0x7aa   :  { %2498 = vmatpush3.msra.mxu0 %v2373_v23  ;;  %2529 = vmatprep.mubr.msk.f32.mxu0 %vm2726_vm1, %v3772_v45 }
 0x7ab   :  { %2499 = vmatprep.subr.mxu0 %v3772_v45 }
 0x7ac   :  { %2500 = vmatpush3.msra.mxu0 %v2372_v27 }
 0x7ad   :  { %2501 = vmatprep.subr.mxu0 %v3772_v45 }
 0x7ae   :  { %2502 = vmatpush3.msra.mxu0 %v2371_v31 }
 0x7af   :  { %2503 = vmatprep.subr.mxu0 %v3772_v45 }
 0x7b0   :  { %2504 = vmatpush3.msra.mxu0 %v2370_v28 }
 0x7b1   :  { %2505 = vmatprep.subr.mxu0 %v3772_v45 }
 0x7b2   :  { %2506 = vmatpush3.msra.mxu0 %v2369_v32 }
 0x7b3   :  { %2507 = vmatprep.subr.mxu0 %v3772_v45 }
 0x7b4   :  { %2508 = vmatpush3.msra.mxu0 %v2368_v44 }
 0x7b5   :  { %2509 = vmatprep.subr.mxu0 %v3772_v45 }
 0x7b6   :  { %2510 = vmatpush3.msra.mxu0 %v2367_v60 }
 0x7b7   :  { %2511 = vmatprep.subr.mxu0 %v3772_v45 }
 0x7b8   :  { %2512 = vmatpush3.msra.mxu0 %v2366_v58 }
 0x7b9   :  { %2513 = vmatprep.subr.mxu0 %v3772_v45 }
 0x7ba   :  { %2514 = vmatpush3.msra.mxu0 %v2365_v62 }
 0x7bb   :  { %2515 = vmatprep.subr.mxu0 %v3772_v45 }
 0x7bc   :  { %2516 = vmatpush3.msra.mxu0 %v2364_v8 }
 0x7bd   :  { %2517 = vmatprep.subr.mxu0 %v3772_v45 }
 0x7be   :  { %2518 = vmatpush3.msra.mxu0 %v2363_v56 }
 0x7bf   :  { %2519 = vmatprep.subr.mxu0 %v3772_v45 }
 0x7c0   :  { %2520 = vmatpush3.msra.mxu0 %v2362_v54 }
 0x7c1   :  { %2521 = vmatprep.subr.mxu0 %v3772_v45 }
 0x7c2   :  { %2522 = vmatpush3.msra.mxu0 %v2361_v57 }
 0x7c3   :  { %2523 = vmatprep.subr.mxu0 %v3772_v45 }
 0x7c4   :  { %2524 = vmatpush3.msra.mxu0 %v2360_v59 }
 0x7c5   :  { %2525 = vmatprep.subr.mxu0 %v3772_v45 }
 0x7c6   :  { %2526 = vmatpush3.msra.mxu0 %v2359_v50 }
 0x7c7   :  { %2527 = vmatprep.subr.mxu0 %v3772_v45 }
 0x7c8   :  { %2528 = vmatpush3.msra.mxu0 %v2358_v52 }
 0x869   :  { %v2227_v63 = vpop.f32.mrf.mxu0  ;;  %v2298_v55 = vpop.f32.mrf.mxu1 }
 0x86b   :  { %v2229_v53 = vpop.f32.mrf.mxu0  ;;  %v2300_v1 = vpop.f32.mrf.mxu1 }
 0x86c   :  { %v2307_v48 = vcombine.low %v2227_v63, %v2229_v53  ;;  %v2308_v4 = vcombine.low %v2298_v55, %v2300_v1 }
 0x86e   :  { %v2315_v6 = vrot.slane %v2307_v48, %v3046_v51  ;;  %v2322_v2 = vrot.slane %v2308_v4, %v3046_v51 }
 0x870   :  { %v2323_v5 = vcombine.low %v2315_v6, %v2322_v2 }
 0x872   :  { %v2330_v13 = vrot.slane %v2323_v5, %v3046_v51 }
 0x874   :  { %v2332_v21 = vadd.f32 %v2330_v13, %v2095_v17 }
 0x876   :  { %v2478_v25 = vmul.f32 -1.442695, %v2332_v21  ;;  %v2340_v33 = vrot.slane %v2332_v21, 3 }
 0x878   :  { %2600 = vpow2.f32 %v2478_v25 }
 0x885   :  { %v2601_v29 = vpop.eup %2600 }
 0x886   :  { %v2336_v45 = vadd.f32 1.0, %v2601_v29 }
 0x888   :  { %2602 = vrcp.f32 %v2336_v45 }
 0x889   :  { %2604 = vtanh.f32 %v2340_v33 }
 0x895   :  { %v2603_v35 = vpop.eup %2602 }
 0x896   :  { %v2345_v37 = vrot.slane %v2603_v35, 1  ;;  %v2605_v39 = vpop.eup %2604  ;;  %v2351_v7 = vrot.slane %v2603_v35, 2 }
 0x897   :  { %v2348_v47 = vmul.f32 %v2605_v39, %v2603_v35 }
 0x898   :  { %v2347_v43 = vmul.f32 %v2345_v37, %v2343_v41 }
 0x89a   :  { %v2349_v49 = vadd.f32 %v2348_v47, %v2347_v43 }
 0x89c   :  { %2606 = vtanh.f32 %v2349_v49  ;;  %2354 = vst [vmem:[#allocation3] sm:$0x1] %v2349_v49 }
 0x8a9   :  { %v2607_v51 = vpop.eup %2606 }
 0x8aa   :  { %v2353_v10 = vmul.f32 %v2607_v51, %v2351_v7 }
 0x8ac   :  { %2355 = vst [vmem:[#allocation2] sm:$0x1] %v2353_v10  ;;  %2356 = vst [vmem:[#allocation5 + $0x7] sm:$0x1] %v2353_v10 }
 0x8b3   :  { %v2357_v14 = vld [vmem:[#allocation5] sm:$0xff] }
 0x8b4   :  { %2530 = vmatmul.mubr.f32.vlgmr.msra.gmra.mxu0 %v2357_v14 }
 0x974   :  { %v2447_v46 = vpop.f32.mrf.mxu0 }
 0x975   :  { %v2448_v22 = vadd.f32 %v2479_v18, %v2447_v46 }
 0x976   :  { %v2531_v26 = vpop.f32.mrf.mxu0 }
 0x977   :  { %2451 = vst [vmem:[#allocation14] sm:$0xff] %v2448_v22 }
 0x978   :  { %2699 = shalt.err (!%p2696_p10)
}
 0x979   :  { %2461 = dma.vmem_to_hbm [thread:$0]  %s2459_s21, 128, %s3591_s6, [#allocation8]  }
 0x97a   :  { %2714 = dma.done.wait [#allocation8], 128  }
 0x97b   :  { %2715 = vsyncadd [#allocation8], 4294967168 }
 0x97c   :  { %2465 = vsyncpa [#allocation7], 1 }
 0x97d   :  { %2466 = vsyncpa [#allocation10], 1 }
 0x97e   :  { %2467 = vsyncpa [#allocation13], 1 }
 0x97f   :  { %2468 = vsyncpa [#allocation8], 1 }

</bundles_post_ra>
